<compile_context>
chip_gen: v6e
topology: v6e:2x2x1
jax: 0.10.0
libtpu: 0.0.40
codegen_flags: <defaults>
</compile_context>

<pallas_src>
import functools
import math

import jax
import jax.numpy as jnp
from jax.experimental import pallas as pl
from jax.experimental.pallas import tpu as pltpu


def _round_up(x, m):
    return (x + m - 1) // m * m


def _tap_offsets(K, Wp):
    """Flat tap offsets (r*Wp + c) for the 4 directions in a Wp-wide padded plane."""
    mid = (K - 1) // 2
    taps = (
        tuple((mid, t) for t in range(K)),          # horizontal      -> para_kernel
        tuple((t, mid) for t in range(K)),          # vertical        -> para_kernel
        tuple((t, t) for t in range(K)),            # main diagonal   -> diag_kernel
        tuple((t, K - 1 - t) for t in range(K)),    # anti diagonal   -> diag_kernel
    )
    return tuple(tuple(r * Wp + c for (r, c) in d_taps) for d_taps in taps)


def pack_dir2dir_weights(para_kernel, diag_kernel):
    """Pre-pack (once, off the hot path) the two 1-D kernels into one block-diagonal
    (4*cout, 4*K*cin) f32 MXU operand; row = d*cout + co, col = d*K*cin + t*cin + ci."""
    cout, cin, K = para_kernel.shape
    w = jnp.zeros((4 * cout, 4 * K * cin), jnp.float32)
    for d, k1d in enumerate((para_kernel, para_kernel, diag_kernel, diag_kernel)):
        # (cout, cin, K) -> (cout, K, cin) -> (cout, K*cin): column index = t*cin + ci.
        blk = jnp.transpose(k1d.astype(jnp.float32), (0, 2, 1)).reshape(cout, K * cin)
        w = w.at[d * cout:(d + 1) * cout, d * K * cin:(d + 1) * K * cin].set(blk)
    return w


def _dir2dir_kernel(w_ref, x_ref, o_ref, xcol_ref, *, B, K, cin, Lq, Lpad, offs):
    """One batch block.  Per element: gather the im2col slab (spatial on lanes) from
    static flat-offset slices, run one block-diagonal MXU dot, store once (lane-dense)."""
    w = w_ref[...]                                            # (4*cout, R_pad) f32, VMEM
    R = 4 * K * cin
    R_pad = xcol_ref.shape[0]
    if R_pad > R:                                             # static; no-op when aligned
        xcol_ref[R:, :] = jnp.zeros((R_pad - R, Lpad), jnp.float32)
    for b in range(B):                                        # static unroll, B is small
        for d in range(4):
            for t in range(K):
                off = offs[d][t]                              # static Python int
                row = (d * K + t) * cin
                # Whole (cin, Lpad) group slab per (direction, tap): spatial slice hoisted
                # out of the channel loop; pad columns/rows in the slab are exact zeros.
                xcol_ref[row:row + cin, :] = x_ref[
                    b, d * cin:(d + 1) * cin, off:off + Lpad].astype(jnp.float32)
        out = jnp.dot(w, xcol_ref[...],                       # (4*cout, Lpad) on the MXU
                      preferred_element_type=jnp.float32,
                      precision=jax.lax.Precision.HIGHEST)
        o_ref[b] = out[:, :Lq].astype(o_ref.dtype)            # single lane-dense store


def _choose_batch_block(N, per_elem_bytes, budget_bytes):
    b = int(max(1, min(N, budget_bytes // max(per_elem_bytes, 1), 8)))
    if N >= 2:
        b = min(b, N // 2)      # keep >= 2 parallel grid steps (v7x has 2 TensorCores)
    b = max(b, 1)
    while N % b:                # block must evenly divide N
        b -= 1
    return b


def dir2dir_conv2d(x, para_kernel, diag_kernel, kernel_size, w_packed=None):
    """x: (N, 4*Cin, H, W) NCHW.  Returns (N, 4*Cout, H, W) (same as the PyTorch forward)."""
    N, C_in, H, W = x.shape
    cout, cin, K = para_kernel.shape
    assert K == kernel_size
    assert diag_kernel.shape == (cout, cin, K)
    assert C_in == 4 * cin, "input must hold 4 directional groups of in_channels_per_dir"
    C_out = 4 * cout

    pad_lo = (K - 1) // 2
    pad_hi = K - 1 - pad_lo
    Wp = W + K - 1                              # width-padded row length
    Hp = H + K - 1
    Lq = H * Wp                                 # per-element output length (pad cols dropped)
    Lpad = _round_up(Lq, 128)                   # lane-aligned dot width
    R = 4 * K * cin                             # im2col rows (contraction dim)
    R_pad = _round_up(R, 8)
    max_off = (K - 1) * (Wp + 1)                # largest tap offset
    P = max(Hp * Wp, max_off + Lpad)            # flat plane length (tap slices in bounds)

    # Single fused host-side zero pad + flatten (spatial lands on the 128-lane axis).
    x_pad = jnp.pad(x, ((0, 0), (0, 0), (pad_lo, pad_hi), (pad_lo, pad_hi)))
    x_flat = x_pad.reshape(N, C_in, Hp * Wp)
    if P > Hp * Wp:
        x_flat = jnp.pad(x_flat, ((0, 0), (0, 0), (0, P - Hp * Wp)))

    if w_packed is None:
        w_packed = pack_dir2dir_weights(para_kernel, diag_kernel)
    if R_pad > R:
        w_packed = jnp.pad(w_packed, ((0, 0), (0, R_pad - R)))

    itemsize = jnp.dtype(x.dtype).itemsize
    per_elem_bytes = 2 * (C_in * P + C_out * Lq) * itemsize     # double-buffered in + out
    xcol_bytes = R_pad * Lpad * 4
    w_bytes = C_out * R_pad * 4
    B = _choose_batch_block(
        N, per_elem_bytes,
        budget_bytes=40 * 1024 * 1024 - xcol_bytes - 2 * w_bytes)
    num_steps = N // B

    # vmem limit derived from actual buffer sizes (2x margin), capped at v7x physical VMEM.
    vmem_needed = B * per_elem_bytes + xcol_bytes + 2 * w_bytes
    vmem_limit = int(min(64 * 1024 * 1024, max(2 * vmem_needed, 4 * 1024 * 1024)))

    offs = _tap_offsets(K, Wp)
    kernel = functools.partial(_dir2dir_kernel, B=B, K=K, cin=cin,
                               Lq=Lq, Lpad=Lpad, offs=offs)
    out_flat = pl.pallas_call(
        kernel,
        out_shape=jax.ShapeDtypeStruct((N, C_out, Lq), x.dtype),
        grid=(num_steps,),
        in_specs=[
            pl.BlockSpec((C_out, R_pad), lambda i: (0, 0)),      # packed weights (VMEM)
            pl.BlockSpec((B, C_in, P), lambda i: (i, 0, 0)),     # flat padded batch block
        ],
        out_specs=pl.BlockSpec((B, C_out, Lq), lambda i: (i, 0, 0)),
        scratch_shapes=[pltpu.VMEM((R_pad, Lpad), jnp.float32)], # im2col slab
        compiler_params=pltpu.CompilerParams(
            dimension_semantics=("parallel",),
            vmem_limit_bytes=vmem_limit),
    )(w_packed, x_flat)

    # (N, C_out, H*Wp) -> (N, C_out, H, Wp) -> drop the garbage pad columns.
    return out_flat.reshape(N, C_out, H, Wp)[:, :, :, :W]


def _ref_dir2dir(x, para_kernel, diag_kernel):
    """Pure-JAX reference: grouped conv with the directional 2-D weights materialized."""
    cout, cin, K = para_kernel.shape
    mid = (K - 1) // 2
    t = jnp.arange(K)

    def place(k1d, rows, cols):
        w = jnp.zeros((cout, cin, K, K), jnp.float32)
        return w.at[:, :, rows, cols].set(k1d.astype(jnp.float32))

    w_h = place(para_kernel, jnp.full((K,), mid), t)
    w_v = place(para_kernel, t, jnp.full((K,), mid))
    w_d = place(diag_kernel, t, t)
    w_a = place(diag_kernel, t, K - 1 - t)
    rhs = jnp.concatenate([w_h, w_v, w_d, w_a], axis=0)      # (4*Cout, Cin, K, K)
    pad_lo = (K - 1) // 2
    pad_hi = K - 1 - pad_lo
    return jax.lax.conv_general_dilated(
        x, rhs, window_strides=(1, 1),
        padding=((pad_lo, pad_hi), (pad_lo, pad_hi)),
        dimension_numbers=("NCHW", "OIHW", "NCHW"),
        feature_group_count=4,
        precision=jax.lax.Precision.HIGHEST)


if __name__ == "__main__":
    key = jax.random.PRNGKey(0)
    k1, k2, k3 = jax.random.split(key, 3)

    # Small module hyper-params.
    in_per_dir, out_per_dir, K = 4, 4, 5
    N, H, W = 2, 16, 16

    # kaiming_uniform_(a=0, mode='fan_in'): bound = sqrt(6 / fan_in), fan_in = cin * K.
    bound = math.sqrt(6.0 / (in_per_dir * K))
    para_kernel = jax.random.uniform(k1, (out_per_dir, in_per_dir, K), jnp.float32,
                                     -bound, bound)
    diag_kernel = jax.random.uniform(k2, (out_per_dir, in_per_dir, K), jnp.float32,
                                     -bound, bound)
    x = jax.random.normal(k3, (N, 4 * in_per_dir, H, W), jnp.float32)

    # Pre-pack the MXU weight operand once, off the hot path (review item).
    w_packed = jax.block_until_ready(pack_dir2dir_weights(para_kernel, diag_kernel))

    conv = jax.jit(dir2dir_conv2d, static_argnames=("kernel_size",))
    out = conv(x, para_kernel, diag_kernel, kernel_size=K, w_packed=w_packed)
    out = jax.block_until_ready(out)
    assert out.shape == (N, 4 * out_per_dir, H, W)

    ref = _ref_dir2dir(x, para_kernel, diag_kernel)
    assert jnp.allclose(out, ref, atol=1e-3, rtol=1e-3), "mismatch vs lax reference"
    print("KERNEL_OK")
</pallas_src>

<mosaic_0001>
module attributes {stable_mosaic.version = 11 : i64} {
  func.func @_dir2dir_kernel(%arg0: i32, %arg1: memref<16x80xf32, #tpu.memory_space<vmem>>, %arg2: memref<1x16x468xf32, #tpu.memory_space<vmem>>, %arg3: memref<1x16x320xf32, #tpu.memory_space<vmem>>, %arg4: memref<80x384xf32, #tpu.memory_space<vmem>>) attributes {dimension_semantics = [#tpu.dimension_semantics<parallel>], iteration_bounds = array<i64: 2>, scalar_prefetch = 0 : i64, scratch_operands = 1 : i64, tpu.core_type = #tpu.core_type<tc>, window_params = [{pipeline_mode = #tpu.pipeline_mode<synchronous>, transform_indices = @transform_0, window_bounds = array<i64: 16, 80>}, {transform_indices = @transform_1, window_bounds = array<i64: 1, 16, 468>}, {transform_indices = @transform_2, window_bounds = array<i64: 1, 16, 320>}]} {
    %c0 = arith.constant 0 : index
    %c0_0 = arith.constant 0 : index
    %0 = vector.load %arg1[%c0, %c0_0] : memref<16x80xf32, #tpu.memory_space<vmem>>, vector<16x80xf32>
    %c0_1 = arith.constant 0 : index
    %c0_2 = arith.constant 0 : index
    %c40 = arith.constant 40 : index
    %1 = vector.load %arg2[%c0_1, %c0_2, %c40] : memref<1x16x468xf32, #tpu.memory_space<vmem>>, vector<1x4x384xf32>
    %2 = vector.shape_cast %1 : vector<1x4x384xf32> to vector<4x384xf32>
    %c0_3 = arith.constant 0 : index
    %c0_4 = arith.constant 0 : index
    %3 = vector.load %arg4[%c0_3, %c0_4] : memref<80x384xf32, #tpu.memory_space<vmem>>, vector<4x384xf32>
    tpu.vector_store %arg4[%c0_3, %c0_4], %2 {strides = array<i32>} : memref<80x384xf32, #tpu.memory_space<vmem>>, vector<4x384xf32>,
    %c0_5 = arith.constant 0 : index
    %c0_6 = arith.constant 0 : index
    %c41 = arith.constant 41 : index
    %4 = vector.load %arg2[%c0_5, %c0_6, %c41] : memref<1x16x468xf32, #tpu.memory_space<vmem>>, vector<1x4x384xf32>
    %5 = vector.shape_cast %4 : vector<1x4x384xf32> to vector<4x384xf32>
    %c4 = arith.constant 4 : index
    %c0_7 = arith.constant 0 : index
    %6 = vector.load %arg4[%c4, %c0_7] : memref<80x384xf32, #tpu.memory_space<vmem>>, vector<4x384xf32>
    tpu.vector_store %arg4[%c4, %c0_7], %5 {strides = array<i32>} : memref<80x384xf32, #tpu.memory_space<vmem>>, vector<4x384xf32>,
    %c0_8 = arith.constant 0 : index
    %c0_9 = arith.constant 0 : index
    %c42 = arith.constant 42 : index
    %7 = vector.load %arg2[%c0_8, %c0_9, %c42] : memref<1x16x468xf32, #tpu.memory_space<vmem>>, vector<1x4x384xf32>
    %8 = vector.shape_cast %7 : vector<1x4x384xf32> to vector<4x384xf32>
    %c8 = arith.constant 8 : index
    %c0_10 = arith.constant 0 : index
    %9 = vector.load %arg4[%c8, %c0_10] : memref<80x384xf32, #tpu.memory_space<vmem>>, vector<4x384xf32>
    tpu.vector_store %arg4[%c8, %c0_10], %8 {strides = array<i32>} : memref<80x384xf32, #tpu.memory_space<vmem>>, vector<4x384xf32>,
    %c0_11 = arith.constant 0 : index
    %c0_12 = arith.constant 0 : index
    %c43 = arith.constant 43 : index
    %10 = vector.load %arg2[%c0_11, %c0_12, %c43] : memref<1x16x468xf32, #tpu.memory_space<vmem>>, vector<1x4x384xf32>
    %11 = vector.shape_cast %10 : vector<1x4x384xf32> to vector<4x384xf32>
    %c12 = arith.constant 12 : index
    %c0_13 = arith.constant 0 : index
    %12 = vector.load %arg4[%c12, %c0_13] : memref<80x384xf32, #tpu.memory_space<vmem>>, vector<4x384xf32>
    tpu.vector_store %arg4[%c12, %c0_13], %11 {strides = array<i32>} : memref<80x384xf32, #tpu.memory_space<vmem>>, vector<4x384xf32>,
    %c0_14 = arith.constant 0 : index
    %c0_15 = arith.constant 0 : index
    %c44 = arith.constant 44 : index
    %13 = vector.load %arg2[%c0_14, %c0_15, %c44] : memref<1x16x468xf32, #tpu.memory_space<vmem>>, vector<1x4x384xf32>
    %14 = vector.shape_cast %13 : vector<1x4x384xf32> to vector<4x384xf32>
    %c16 = arith.constant 16 : index
    %c0_16 = arith.constant 0 : index
    %15 = vector.load %arg4[%c16, %c0_16] : memref<80x384xf32, #tpu.memory_space<vmem>>, vector<4x384xf32>
    tpu.vector_store %arg4[%c16, %c0_16], %14 {strides = array<i32>} : memref<80x384xf32, #tpu.memory_space<vmem>>, vector<4x384xf32>,
    %c0_17 = arith.constant 0 : index
    %c4_18 = arith.constant 4 : index
    %c2 = arith.constant 2 : index
    %16 = vector.load %arg2[%c0_17, %c4_18, %c2] : memref<1x16x468xf32, #tpu.memory_space<vmem>>, vector<1x4x384xf32>
    %17 = vector.shape_cast %16 : vector<1x4x384xf32> to vector<4x384xf32>
    %c20 = arith.constant 20 : index
    %c0_19 = arith.constant 0 : index
    %18 = vector.load %arg4[%c20, %c0_19] : memref<80x384xf32, #tpu.memory_space<vmem>>, vector<4x384xf32>
    tpu.vector_store %arg4[%c20, %c0_19], %17 {strides = array<i32>} : memref<80x384xf32, #tpu.memory_space<vmem>>, vector<4x384xf32>,
    %c0_20 = arith.constant 0 : index
    %c4_21 = arith.constant 4 : index
    %c22 = arith.constant 22 : index
    %19 = vector.load %arg2[%c0_20, %c4_21, %c22] : memref<1x16x468xf32, #tpu.memory_space<vmem>>, vector<1x4x384xf32>
    %20 = vector.shape_cast %19 : vector<1x4x384xf32> to vector<4x384xf32>
    %c24 = arith.constant 24 : index
    %c0_22 = arith.constant 0 : index
    %21 = vector.load %arg4[%c24, %c0_22] : memref<80x384xf32, #tpu.memory_space<vmem>>, vector<4x384xf32>
    tpu.vector_store %arg4[%c24, %c0_22], %20 {strides = array<i32>} : memref<80x384xf32, #tpu.memory_space<vmem>>, vector<4x384xf32>,
    %c0_23 = arith.constant 0 : index
    %c4_24 = arith.constant 4 : index
    %c42_25 = arith.constant 42 : index
    %22 = vector.load %arg2[%c0_23, %c4_24, %c42_25] : memref<1x16x468xf32, #tpu.memory_space<vmem>>, vector<1x4x384xf32>
    %23 = vector.shape_cast %22 : vector<1x4x384xf32> to vector<4x384xf32>
    %c28 = arith.constant 28 : index
    %c0_26 = arith.constant 0 : index
    %24 = vector.load %arg4[%c28, %c0_26] : memref<80x384xf32, #tpu.memory_space<vmem>>, vector<4x384xf32>
    tpu.vector_store %arg4[%c28, %c0_26], %23 {strides = array<i32>} : memref<80x384xf32, #tpu.memory_space<vmem>>, vector<4x384xf32>,
    %c0_27 = arith.constant 0 : index
    %c4_28 = arith.constant 4 : index
    %c62 = arith.constant 62 : index
    %25 = vector.load %arg2[%c0_27, %c4_28, %c62] : memref<1x16x468xf32, #tpu.memory_space<vmem>>, vector<1x4x384xf32>
    %26 = vector.shape_cast %25 : vector<1x4x384xf32> to vector<4x384xf32>
    %c32 = arith.constant 32 : index
    %c0_29 = arith.constant 0 : index
    %27 = vector.load %arg4[%c32, %c0_29] : memref<80x384xf32, #tpu.memory_space<vmem>>, vector<4x384xf32>
    tpu.vector_store %arg4[%c32, %c0_29], %26 {strides = array<i32>} : memref<80x384xf32, #tpu.memory_space<vmem>>, vector<4x384xf32>,
    %c0_30 = arith.constant 0 : index
    %c4_31 = arith.constant 4 : index
    %c82 = arith.constant 82 : index
    %28 = vector.load %arg2[%c0_30, %c4_31, %c82] : memref<1x16x468xf32, #tpu.memory_space<vmem>>, vector<1x4x384xf32>
    %29 = vector.shape_cast %28 : vector<1x4x384xf32> to vector<4x384xf32>
    %c36 = arith.constant 36 : index
    %c0_32 = arith.constant 0 : index
    %30 = vector.load %arg4[%c36, %c0_32] : memref<80x384xf32, #tpu.memory_space<vmem>>, vector<4x384xf32>
    tpu.vector_store %arg4[%c36, %c0_32], %29 {strides = array<i32>} : memref<80x384xf32, #tpu.memory_space<vmem>>, vector<4x384xf32>,
    %c0_33 = arith.constant 0 : index
    %c8_34 = arith.constant 8 : index
    %c0_35 = arith.constant 0 : index
    %31 = vector.load %arg2[%c0_33, %c8_34, %c0_35] : memref<1x16x468xf32, #tpu.memory_space<vmem>>, vector<1x4x384xf32>
    %32 = vector.shape_cast %31 : vector<1x4x384xf32> to vector<4x384xf32>
    %c40_36 = arith.constant 40 : index
    %c0_37 = arith.constant 0 : index
    %33 = vector.load %arg4[%c40_36, %c0_37] : memref<80x384xf32, #tpu.memory_space<vmem>>, vector<4x384xf32>
    tpu.vector_store %arg4[%c40_36, %c0_37], %32 {strides = array<i32>} : memref<80x384xf32, #tpu.memory_space<vmem>>, vector<4x384xf32>,
    %c0_38 = arith.constant 0 : index
    %c8_39 = arith.constant 8 : index
    %c21 = arith.constant 21 : index
    %34 = vector.load %arg2[%c0_38, %c8_39, %c21] : memref<1x16x468xf32, #tpu.memory_space<vmem>>, vector<1x4x384xf32>
    %35 = vector.shape_cast %34 : vector<1x4x384xf32> to vector<4x384xf32>
    %c44_40 = arith.constant 44 : index
    %c0_41 = arith.constant 0 : index
    %36 = vector.load %arg4[%c44_40, %c0_41] : memref<80x384xf32, #tpu.memory_space<vmem>>, vector<4x384xf32>
    tpu.vector_store %arg4[%c44_40, %c0_41], %35 {strides = array<i32>} : memref<80x384xf32, #tpu.memory_space<vmem>>, vector<4x384xf32>,
    %c0_42 = arith.constant 0 : index
    %c8_43 = arith.constant 8 : index
    %c42_44 = arith.constant 42 : index
    %37 = vector.load %arg2[%c0_42, %c8_43, %c42_44] : memref<1x16x468xf32, #tpu.memory_space<vmem>>, vector<1x4x384xf32>
    %38 = vector.shape_cast %37 : vector<1x4x384xf32> to vector<4x384xf32>
    %c48 = arith.constant 48 : index
    %c0_45 = arith.constant 0 : index
    %39 = vector.load %arg4[%c48, %c0_45] : memref<80x384xf32, #tpu.memory_space<vmem>>, vector<4x384xf32>
    tpu.vector_store %arg4[%c48, %c0_45], %38 {strides = array<i32>} : memref<80x384xf32, #tpu.memory_space<vmem>>, vector<4x384xf32>,
    %c0_46 = arith.constant 0 : index
    %c8_47 = arith.constant 8 : index
    %c63 = arith.constant 63 : index
    %40 = vector.load %arg2[%c0_46, %c8_47, %c63] : memref<1x16x468xf32, #tpu.memory_space<vmem>>, vector<1x4x384xf32>
    %41 = vector.shape_cast %40 : vector<1x4x384xf32> to vector<4x384xf32>
    %c52 = arith.constant 52 : index
    %c0_48 = arith.constant 0 : index
    %42 = vector.load %arg4[%c52, %c0_48] : memref<80x384xf32, #tpu.memory_space<vmem>>, vector<4x384xf32>
    tpu.vector_store %arg4[%c52, %c0_48], %41 {strides = array<i32>} : memref<80x384xf32, #tpu.memory_space<vmem>>, vector<4x384xf32>,
    %c0_49 = arith.constant 0 : index
    %c8_50 = arith.constant 8 : index
    %c84 = arith.constant 84 : index
    %43 = vector.load %arg2[%c0_49, %c8_50, %c84] : memref<1x16x468xf32, #tpu.memory_space<vmem>>, vector<1x4x384xf32>
    %44 = vector.shape_cast %43 : vector<1x4x384xf32> to vector<4x384xf32>
    %c56 = arith.constant 56 : index
    %c0_51 = arith.constant 0 : index
    %45 = vector.load %arg4[%c56, %c0_51] : memref<80x384xf32, #tpu.memory_space<vmem>>, vector<4x384xf32>
    tpu.vector_store %arg4[%c56, %c0_51], %44 {strides = array<i32>} : memref<80x384xf32, #tpu.memory_space<vmem>>, vector<4x384xf32>,
    %c0_52 = arith.constant 0 : index
    %c12_53 = arith.constant 12 : index
    %c4_54 = arith.constant 4 : index
    %46 = vector.load %arg2[%c0_52, %c12_53, %c4_54] : memref<1x16x468xf32, #tpu.memory_space<vmem>>, vector<1x4x384xf32>
    %47 = vector.shape_cast %46 : vector<1x4x384xf32> to vector<4x384xf32>
    %c60 = arith.constant 60 : index
    %c0_55 = arith.constant 0 : index
    %48 = vector.load %arg4[%c60, %c0_55] : memref<80x384xf32, #tpu.memory_space<vmem>>, vector<4x384xf32>
    tpu.vector_store %arg4[%c60, %c0_55], %47 {strides = array<i32>} : memref<80x384xf32, #tpu.memory_space<vmem>>, vector<4x384xf32>,
    %c0_56 = arith.constant 0 : index
    %c12_57 = arith.constant 12 : index
    %c23 = arith.constant 23 : index
    %49 = vector.load %arg2[%c0_56, %c12_57, %c23] : memref<1x16x468xf32, #tpu.memory_space<vmem>>, vector<1x4x384xf32>
    %50 = vector.shape_cast %49 : vector<1x4x384xf32> to vector<4x384xf32>
    %c64 = arith.constant 64 : index
    %c0_58 = arith.constant 0 : index
    %51 = vector.load %arg4[%c64, %c0_58] : memref<80x384xf32, #tpu.memory_space<vmem>>, vector<4x384xf32>
    tpu.vector_store %arg4[%c64, %c0_58], %50 {strides = array<i32>} : memref<80x384xf32, #tpu.memory_space<vmem>>, vector<4x384xf32>,
    %c0_59 = arith.constant 0 : index
    %c12_60 = arith.constant 12 : index
    %c42_61 = arith.constant 42 : index
    %52 = vector.load %arg2[%c0_59, %c12_60, %c42_61] : memref<1x16x468xf32, #tpu.memory_space<vmem>>, vector<1x4x384xf32>
    %53 = vector.shape_cast %52 : vector<1x4x384xf32> to vector<4x384xf32>
    %c68 = arith.constant 68 : index
    %c0_62 = arith.constant 0 : index
    %54 = vector.load %arg4[%c68, %c0_62] : memref<80x384xf32, #tpu.memory_space<vmem>>, vector<4x384xf32>
    tpu.vector_store %arg4[%c68, %c0_62], %53 {strides = array<i32>} : memref<80x384xf32, #tpu.memory_space<vmem>>, vector<4x384xf32>,
    %c0_63 = arith.constant 0 : index
    %c12_64 = arith.constant 12 : index
    %c61 = arith.constant 61 : index
    %55 = vector.load %arg2[%c0_63, %c12_64, %c61] : memref<1x16x468xf32, #tpu.memory_space<vmem>>, vector<1x4x384xf32>
    %56 = vector.shape_cast %55 : vector<1x4x384xf32> to vector<4x384xf32>
    %c72 = arith.constant 72 : index
    %c0_65 = arith.constant 0 : index
    %57 = vector.load %arg4[%c72, %c0_65] : memref<80x384xf32, #tpu.memory_space<vmem>>, vector<4x384xf32>
    tpu.vector_store %arg4[%c72, %c0_65], %56 {strides = array<i32>} : memref<80x384xf32, #tpu.memory_space<vmem>>, vector<4x384xf32>,
    %c0_66 = arith.constant 0 : index
    %c12_67 = arith.constant 12 : index
    %c80 = arith.constant 80 : index
    %58 = vector.load %arg2[%c0_66, %c12_67, %c80] : memref<1x16x468xf32, #tpu.memory_space<vmem>>, vector<1x4x384xf32>
    %59 = vector.shape_cast %58 : vector<1x4x384xf32> to vector<4x384xf32>
    %c76 = arith.constant 76 : index
    %c0_68 = arith.constant 0 : index
    %60 = vector.load %arg4[%c76, %c0_68] : memref<80x384xf32, #tpu.memory_space<vmem>>, vector<4x384xf32>
    tpu.vector_store %arg4[%c76, %c0_68], %59 {strides = array<i32>} : memref<80x384xf32, #tpu.memory_space<vmem>>, vector<4x384xf32>,
    %c0_69 = arith.constant 0 : index
    %c0_70 = arith.constant 0 : index
    %61 = vector.load %arg4[%c0_69, %c0_70] : memref<80x384xf32, #tpu.memory_space<vmem>>, vector<80x384xf32>
    %cst = arith.constant dense<0.000000e+00> : vector<16x384xf32>
    %62 = tpu.matmul %0, %61, %cst {dimension_numbers = #tpu.dot_dimension_numbers<[1], [0], [0], [1], [0, 0, 1, 1], [], []>, precision = #tpu.contract_precision<fp32>} : vector<16x80xf32>, vector<80x384xf32>, vector<16x384xf32> -> vector<16x384xf32>
    %63 = vector.extract_strided_slice %62 {offsets = [0, 0], sizes = [16, 320], strides = [1, 1]} : vector<16x384xf32> to vector<16x320xf32>
    %c0_71 = arith.constant 0 : index
    %c0_72 = arith.constant 0 : index
    %c0_73 = arith.constant 0 : index
    %64 = vector.load %arg3[%c0_71, %c0_72, %c0_73] : memref<1x16x320xf32, #tpu.memory_space<vmem>>, vector<1x16x320xf32>
    %65 = vector.shape_cast %64 : vector<1x16x320xf32> to vector<16x320xf32>
    %66 = vector.shape_cast %63 : vector<16x320xf32> to vector<1x16x320xf32>
    tpu.vector_store %arg3[%c0_71, %c0_72, %c0_73], %66 {strides = array<i32>} : memref<1x16x320xf32, #tpu.memory_space<vmem>>, vector<1x16x320xf32>,
    return
  }
  func.func @transform_0(%arg0: i32) -> (i32, i32) {
    %c0_i32 = arith.constant 0 : i32
    %c0_i32_0 = arith.constant 0 : i32
    %c0_i32_1 = arith.constant 0 : i32
    return %c0_i32, %c0_i32_0 : i32, i32
  }
  func.func @transform_1(%arg0: i32) -> (i32, i32, i32) {
    %c0_i32 = arith.constant 0 : i32
    %c0_i32_0 = arith.constant 0 : i32
    %c0_i32_1 = arith.constant 0 : i32
    return %arg0, %c0_i32, %c0_i32_0 : i32, i32, i32
  }
  func.func @transform_2(%arg0: i32) -> (i32, i32, i32) {
    %c0_i32 = arith.constant 0 : i32
    %c0_i32_0 = arith.constant 0 : i32
    %c0_i32_1 = arith.constant 0 : i32
    return %arg0, %c0_i32, %c0_i32_0 : i32, i32, i32
  }
}

</mosaic_0001>

<bundles_post_ra>
// kernel: dir2dir_conv2d.1
= control target key start
LH: loop header
LB: loop body
LE: loop exit
PB: predicated region body
PF: predicated region fallthrough
CT: control target
= control target key end

     0   :  { %s2415_s9 = smov 0   ;;  %s3302_s0 = inlined_call_operand.vmem [shape: f32[16,80], index: 0, kind: input, shape index: {}]   ;;  %s3303_s1 = inlined_call_operand.vmem [shape: f32[2,16,468], index: 1, kind: input, shape index: {}]   ;;  %s3304_s2 = inlined_call_operand.vmem [shape: f32[2,16,320], index: 2, kind: output, shape index: {}]  }
   0x1 LB: > { %s2128_s10 = sadd.s32 4294967295, %s2381_s9   ;;  %p2132_p0 = scmp.ge.s32.totalorder %s2381_s9, 1  ;;  %s2381_s9 = sphi %s2415_s9, %s12_s9  }
   0x2   : > { %p112_p1 = scmp.lt.s32.totalorder %s2381_s9, 3 }
   0x4   : > { %p113_p2 = pnand %p2132_p0, %p112_p1 }
   0x6   : > { %116 = sbr.rel (%p113_p2) target bundleno = 579 (0x243), region = 28 }
   0xb   : > { %p134_p3 = scmp.lt.s32.totalorder %s2128_s10, 1  ;;  %s2383_s15 = smov 48   ;;  %vm665_vm0 = vcmask 392192   ;;  %vm639_vm1 = vcmask 547840   ;;  %vm584_vm2 = vcmask 859136   ;;  %vm218_vm3 = vcmask 703488  }
   0xc   : > { %s2384_s16 = smov 67   ;;  %s2385_s17 = smov 105   ;;  %vm528_vm4 = vcmask 359424   ;;  %vm554_vm5 = vcmask 1014784   ;;  %vm502_vm6 = vcmask 531456   ;;  %vm447_vm7 = vcmask 875520  }
   0xd   : > { %s3373_s10 = smov (!%p134_p3, %s2128_s10), 1  ;;  %s2386_s18 = smov 86   ;;  %vm385_vm8 = vcmask 539648   ;;  %vm411_vm9 = vcmask 375808   ;;  %vm330_vm10 = vcmask 867328   ;;  %vm274_vm11 = vcmask 687104  }
   0xe   : > { %s2138_s11 = sshll.u32 %s3373_s10, 6  ;;  %s2387_s19 = smov 44   ;;  %vm300_vm12 = vcmask 1031168   ;;  %vm3320_vm13 = vcmask 695296   ;;  %vm705_vm14 = vcmask 654336   ;;  %vm162_vm15 = vcmask 719872  }
   0xf   : > { %s2429_s14 = scalar_lea.vmem %s3303_s1, %s2138_s11  ;;  %s2388_s20 = smov 124  }
  0x10   : > { %v650_v0 = vld [vmem:[%s2429_s14 + $0x28] sm:$0xf0]  ;;  %v621_v3 = vld [vmem:[%s2429_s14 + $0x30] sm:$0xf0]  ;;  %v619_v6 = vld [vmem:[%s2429_s14 + $0x20] sm:$0xf0] }
  0x11   : > { %v620_v1 = vld [vmem:[%s2429_s14 + $0x28] sm:$0xf0]  ;;  %659 = vrot.lane.b32.xlu1 %v650_v0, %s2383_s15  ;;  %v651_v4 = vld [vmem:[%s2429_s14 + $0x30] sm:$0xf0]  ;;  %v629_v5 = vrot.slane %v621_v3, 4  ;;  %v627_v9 = vrot.slane %v619_v6, 4 }
  0x12   : > { %v628_v2 = vrot.slane %v620_v1, 4  ;;  %v649_v7 = vld [vmem:[%s2429_s14 + $0x20] sm:$0xf0]  ;;  %v566_v8 = vld [vmem:[%s2429_s14 + $0x30] sm:$0xf0]  ;;  %s2389_s21 = smov 65  }
  0x13   : > { %v565_v10 = vld [vmem:[%s2429_s14 + $0x28] sm:$0xf0]  ;;  %v574_v11 = vrot.slane %v566_v8, 4  ;;  %v596_v13 = vld [vmem:[%s2429_s14 + $0x30] sm:$0xf0]  ;;  %s2390_s22 = smov 107  }
  0x14   : > { %633 = vrot.lane.b32.xlu0 %v628_v2, %s2384_s16  ;;  %v573_v12 = vrot.slane %v565_v10, 4  ;;  %v595_v14 = vld [vmem:[%s2429_s14 + $0x28] sm:$0xf0]  ;;  %v564_v15 = vld [vmem:[%s2429_s14 + $0x20] sm:$0xf0]  ;;  %s2391_s23 = smov 66  }
  0x15   : > { %661 = vrot.lane.b32.xlu1 %v651_v4, %s2383_s15  ;;  %v594_v16 = vld [vmem:[%s2429_s14 + $0x20] sm:$0xf0]  ;;  %v572_v17 = vrot.slane %v564_v15, 4  ;;  %v514_v18 = vld [vmem:[%s2429_s14 + $0x30] sm:$0xf]  ;;  %s2392_s24 = smov 46  }
  0x16   : > { %v513_v19 = vld [vmem:[%s2429_s14 + $0x28] sm:$0xf]  ;;  %v540_v20 = vld [vmem:[%s2429_s14 + $0x30] sm:$0xf0]  ;;  %v539_v21 = vld [vmem:[%s2429_s14 + $0x28] sm:$0xf0] }
  0x17   : > { %v538_v22 = vld [vmem:[%s2429_s14 + $0x20] sm:$0xf0]  ;;  %v512_v23 = vld [vmem:[%s2429_s14 + $0x20] sm:$0xf]  ;;  %v459_v24 = vld [vmem:[%s2429_s14 + $0x30] sm:$0xf] }
  0x18   : > { %635 = vrot.lane.b32.xlu0 %v629_v5, %s2384_s16  ;;  %v484_v25 = vld [vmem:[%s2429_s14 + $0x30] sm:$0xf]  ;;  %v458_v26 = vld [vmem:[%s2429_s14 + $0x28] sm:$0xf]  ;;  %v482_v29 = vld [vmem:[%s2429_s14 + $0x20] sm:$0xf] }
  0x19   : > { %657 = vrot.lane.b32.xlu1 %v649_v7, %s2383_s15  ;;  %v483_v27 = vld [vmem:[%s2429_s14 + $0x28] sm:$0xf]  ;;  %v492_v28 = vrot.slane %v484_v25, 4  ;;  %v490_v32 = vrot.slane %v482_v29, 4  ;;  %v429_v33 = vld [vmem:[%s2429_s14 + $0x30] sm:$0xf] }
  0x1a   : > { %v491_v30 = vrot.slane %v483_v27, 4  ;;  %v422_v31 = vld [vmem:[%s2429_s14 + $0x28] sm:$0xf]  ;;  %v421_v34 = vld [vmem:[%s2429_s14 + $0x20] sm:$0xf]  ;;  %v437_v37 = vrot.slane %v429_v33, 4 }
  0x1b   : > { %425 = vst [vmem:[#allocation2 + $0x8] sm:$0xf] %v422_v31  ;;  %v457_v35 = vld [vmem:[%s2429_s14 + $0x20] sm:$0xf]  ;;  %v428_v36 = vld [vmem:[%s2429_s14 + $0x28] sm:$0xf] }
  0x1c   : > { %631 = vrot.lane.b32.xlu0 %v627_v9, %s2384_s16  ;;  %424 = vst [vmem:[#allocation2 + $0x40] sm:$0xf] %v421_v34  ;;  %v366_v38 = vld [vmem:[%s2429_s14 + $0x8] sm:$0xf0]  ;;  %v436_v39 = vrot.slane %v428_v36, 4  ;;  %s2393_s25 = smov 106  }
  0x1d   : > { %580 = vrot.lane.b32.xlu1 %v574_v11, %s2385_s17  ;;  %v427_v40 = vld [vmem:[%s2429_s14 + $0x20] sm:$0xf]  ;;  %v374_v41 = vrot.slane %v366_v38, 4  ;;  %v367_v43 = vld [vmem:[%s2429_s14 + $0x10] sm:$0xf0]  ;;  %s2394_s26 = smov 84  }
  0x1e   : > { %v435_v42 = vrot.slane %v427_v40, 4  ;;  %v396_v44 = vld [vmem:[%s2429_s14 + $0x8] sm:$0xf0]  ;;  %v365_v45 = vld [vmem:[%s2429_s14] sm:$0xf0]  ;;  %v375_v46 = vrot.slane %v367_v43, 4 }
  0x1f   : > { %v373_v47 = vrot.slane %v365_v45, 4  ;;  %v311_v48 = vld [vmem:[%s2429_s14 + $0x8] sm:$0xf0]  ;;  %v397_v49 = vld [vmem:[%s2429_s14 + $0x10] sm:$0xf0]  ;;  %s2395_s27 = smov 126  }
  0x20   : > { %578 = vrot.lane.b32.xlu0 %v573_v12, %s2385_s17  ;;  %v319_v50 = vrot.slane %v311_v48, 4  ;;  %v395_v51 = vld [vmem:[%s2429_s14] sm:$0xf0]  ;;  %v312_v52 = vld [vmem:[%s2429_s14 + $0x10] sm:$0xf0]  ;;  %s2396_s28 = smov 85  }
  0x21   : > { %606 = vrot.lane.b32.xlu1 %v596_v13, %s2386_s18  ;;  %v341_v53 = vld [vmem:[%s2429_s14 + $0x8] sm:$0xf0]  ;;  %v310_v54 = vld [vmem:[%s2429_s14] sm:$0xf0]  ;;  %v320_v55 = vrot.slane %v312_v52, 4  ;;  %s2397_s29 = smov 88  }
  0x22   : > { %v318_v56 = vrot.slane %v310_v54, 4  ;;  %v342_v57 = vld [vmem:[%s2429_s14 + $0x10] sm:$0xf0]  ;;  %v259_v58 = vld [vmem:[%s2429_s14 + $0x8] sm:$0xf]  ;;  %s2398_s30 = smov 87  }
  0x23   : > { %v340_v59 = vld [vmem:[%s2429_s14] sm:$0xf0]  ;;  %v285_v60 = vld [vmem:[%s2429_s14 + $0x8] sm:$0xf0]  ;;  %v260_v61 = vld [vmem:[%s2429_s14 + $0x10] sm:$0xf] }
  0x24   : > { %604 = vrot.lane.b32.xlu0 %v595_v14, %s2386_s18  ;;  %v258_v62 = vld [vmem:[%s2429_s14] sm:$0xf]  ;;  %v286_v63 = vld [vmem:[%s2429_s14 + $0x10] sm:$0xf0]  ;;  %v203_v0 = vld [vmem:[%s2429_s14 + $0x8] sm:$0xf] }
  0x25   : > { %602 = vrot.lane.b32.xlu1 %v594_v16, %s2386_s18  ;;  %v229_v1 = vld [vmem:[%s2429_s14 + $0x8] sm:$0xf]  ;;  %v284_v2 = vld [vmem:[%s2429_s14] sm:$0xf0]  ;;  %v204_v4 = vld [vmem:[%s2429_s14 + $0x10] sm:$0xf] }
  0x26   : > { %v237_v3 = vrot.slane %v229_v1, 4  ;;  %v230_v5 = vld [vmem:[%s2429_s14 + $0x10] sm:$0xf]  ;;  %v202_v6 = vld [vmem:[%s2429_s14] sm:$0xf]  ;;  %s2349_s7 = smul.u32 48, %s3373_s10 }
  0x27   : > { %v238_v7 = vrot.slane %v230_v5, 4  ;;  %v228_v8 = vld [vmem:[%s2429_s14] sm:$0xf]  ;;  %v147_v9 = vld [vmem:[%s2429_s14 + $0x8] sm:$0xf] }
  0x28   : > { %576 = vrot.lane.b32.xlu0 %v572_v17, %s2385_s17  ;;  %v173_v10 = vld [vmem:[%s2429_s14 + $0x8] sm:$0xf]  ;;  %v236_v11 = vrot.slane %v228_v8, 4  ;;  %v148_v13 = vld [vmem:[%s2429_s14 + $0x10] sm:$0xf]  ;;  %s3291_s12 = scalar_lea.vmem %s3304_s2, %s2349_s7 }
  0x29   : > { %524 = vrot.lane.b32.xlu1 %v514_v18, %s2387_s19  ;;  %v181_v12 = vrot.slane %v173_v10, 4  ;;  %v174_v14 = vld [vmem:[%s2429_s14 + $0x10] sm:$0xf]  ;;  %v146_v15 = vld [vmem:[%s2429_s14] sm:$0xf] }
  0x2a   : > { %v622_v16 = vld [vmem:[%s2429_s14 + $0x38] sm:$0xf0]  ;;  %v182_v17 = vrot.slane %v174_v14, 4  ;;  %v172_v18 = vld [vmem:[%s2429_s14] sm:$0xf] }
  0x2b   : > { %v652_v25 = vld [vmem:[%s2429_s14 + $0x38] sm:$0xf0]  ;;  %v515_v27 = vld [vmem:[%s2429_s14 + $0x38] sm:$0xf] }
  0x2c   : > { %522 = vrot.lane.b32.xlu0 %v513_v19, %s2387_s19  ;;  %v630_v19 = vrot.slane %v622_v16, 4  ;;  %v460_v33 = vld [vmem:[%s2429_s14 + $0x38] sm:$0xf]  ;;  %v368_v45 = vld [vmem:[%s2429_s14 + $0x18] sm:$0xf0] }
  0x2d   : > { %550 = vrot.lane.b32.xlu1 %v540_v20, %s2388_s20  ;;  %v567_v20 = vld [vmem:[%s2429_s14 + $0x38] sm:$0xf0]  ;;  %v430_v34 = vld [vmem:[%s2429_s14 + $0x38] sm:$0xf]  ;;  %v376_v52 = vrot.slane %v368_v45, 4 }
  0x2e   : > { %v485_v38 = vld [vmem:[%s2429_s14 + $0x38] sm:$0xf] }
  0x2f   : > { %v231_v8 = vld [vmem:[%s2429_s14 + $0x18] sm:$0xf] }
  0x30   : > { %548 = vrot.lane.b32.xlu0 %v539_v21, %s2388_s20  ;;  %v180_v21 = vrot.slane %v172_v18, 4  ;;  %v239_v14 = vrot.slane %v231_v8, 4  ;;  %v175_v18 = vld [vmem:[%s2429_s14 + $0x18] sm:$0xf] }
  0x31   : > { %546 = vrot.lane.b32.xlu1 %v538_v22, %s2388_s20  ;;  %v575_v22 = vrot.slane %v567_v20, 4 }
  0x34   : > { %520 = vrot.lane.b32.xlu0 %v512_v23, %s2387_s19 }
  0x35   : > { %469 = vrot.lane.b32.xlu1 %v459_v24, %s2386_s18  ;;  %v3321_v24 = vmov 0.0  }
  0x36   : > { %796 = vmatprep.mubr.f32.mxu0 %v3321_v24  ;;  %983 = vmatprep.mubr.f32.mxu1 %v3321_v24 }
  0x38   : > { %467 = vrot.lane.b32.xlu0 %v458_v26, %s2386_s18 }
  0x39   : > { %498 = vrot.lane.b32.xlu1 %v492_v28, %s2389_s21 }
  0x3c   : > { %496 = vrot.lane.b32.xlu0 %v491_v30, %s2389_s21  ;;  %v597_v30 = vld [vmem:[%s2429_s14 + $0x38] sm:$0xf0] }
  0x3d   : > { %494 = vrot.lane.b32.xlu1 %v490_v32, %s2389_s21 }
  0x40   : > { %465 = vrot.lane.b32.xlu0 %v457_v35, %s2386_s18 }
  0x41   : > { %443 = vrot.lane.b32.xlu1 %v437_v37, %s2390_s22  ;;  %v541_v37 = vld [vmem:[%s2429_s14 + $0x38] sm:$0xf0] }
  0x44   : > { %441 = vrot.lane.b32.xlu0 %v436_v39, %s2390_s22  ;;  %v423_v39 = vld [vmem:[%s2429_s14 + $0x30] sm:$0xf] }
  0x45   : > { %379 = vrot.lane.b32.xlu1 %v374_v41, %s2391_s23  ;;  %v438_v41 = vrot.slane %v430_v34, 4  ;;  %426 = vst [vmem:[#allocation2 + $0x78] sm:$0xf] %v423_v39 }
  0x48   : > { %439 = vrot.lane.b32.xlu0 %v435_v42, %s2390_s22 }
  0x49   : > { %405 = vrot.lane.b32.xlu1 %v396_v44, %s2392_s24  ;;  %v493_v44 = vrot.slane %v485_v38, 4 }
  0x4c   : > { %381 = vrot.lane.b32.xlu0 %v375_v46, %s2391_s23 }
  0x4d   : > { %377 = vrot.lane.b32.xlu1 %v373_v47, %s2391_s23 }
  0x50   : > { %407 = vrot.lane.b32.xlu0 %v397_v49, %s2392_s24  ;;  %v398_v49 = vld [vmem:[%s2429_s14 + $0x18] sm:$0xf0] }
  0x51   : > { %324 = vrot.lane.b32.xlu1 %v319_v50, %s2393_s25 }
  0x54   : > { %403 = vrot.lane.b32.xlu0 %v395_v51, %s2392_s24 }
  0x55   : > { %350 = vrot.lane.b32.xlu1 %v341_v53, %s2386_s18  ;;  %v313_v53 = vld [vmem:[%s2429_s14 + $0x18] sm:$0xf0] }
  0x58   : > { %326 = vrot.lane.b32.xlu0 %v320_v55, %s2393_s25 }
  0x59   : > { %322 = vrot.lane.b32.xlu1 %v318_v56, %s2393_s25 }
  0x5c   : > { %352 = vrot.lane.b32.xlu0 %v342_v57, %s2386_s18 }
  0x5d   : > { %268 = vrot.lane.b32.xlu1 %v259_v58, %s2394_s26  ;;  %v343_v58 = vld [vmem:[%s2429_s14 + $0x18] sm:$0xf0] }
  0x60   : > { %348 = vrot.lane.b32.xlu0 %v340_v59, %s2386_s18 }
  0x61   : > { %294 = vrot.lane.b32.xlu1 %v285_v60, %s2395_s27 }
  0x64   : > { %270 = vrot.lane.b32.xlu0 %v260_v61, %s2394_s26  ;;  %v321_v61 = vrot.slane %v313_v53, 4 }
  0x65   : > { %266 = vrot.lane.b32.xlu1 %v258_v62, %s2394_s26 }
  0x68   : > { %296 = vrot.lane.b32.xlu0 %v286_v63, %s2395_s27 }
  0x69   : > { %212 = vrot.lane.b32.xlu1 %v203_v0, %s2386_s18 }
  0x6c   : > { %292 = vrot.lane.b32.xlu0 %v284_v2, %s2395_s27 }
  0x6d   : > { %242 = vrot.lane.b32.xlu1 %v237_v3, %s2396_s28 }
  0x70   : > { %214 = vrot.lane.b32.xlu0 %v204_v4, %s2386_s18  ;;  %v287_v4 = vld [vmem:[%s2429_s14 + $0x18] sm:$0xf0] }
  0x71   : > { %210 = vrot.lane.b32.xlu1 %v202_v6, %s2386_s18 }
  0x74   : > { %244 = vrot.lane.b32.xlu0 %v238_v7, %s2396_s28 }
  0x75   : > { %156 = vrot.lane.b32.xlu1 %v147_v9, %s2397_s29  ;;  %v261_v9 = vld [vmem:[%s2429_s14 + $0x18] sm:$0xf] }
  0x78   : > { %240 = vrot.lane.b32.xlu0 %v236_v11, %s2396_s28 }
  0x79   : > { %186 = vrot.lane.b32.xlu1 %v181_v12, %s2398_s30 }
  0x7c   : > { %158 = vrot.lane.b32.xlu0 %v148_v13, %s2397_s29 }
  0x7d   : > { %154 = vrot.lane.b32.xlu1 %v146_v15, %s2397_s29 }
  0x80   : > { %188 = vrot.lane.b32.xlu0 %v182_v17, %s2398_s30 }
  0x81   : > { %637 = vrot.lane.b32.xlu1 %v630_v19, %s2384_s16  ;;  %v205_v19 = vld [vmem:[%s2429_s14 + $0x18] sm:$0xf] }
  0x83   : > { %v660_v23 = vpop.permute.xlu1 %659 }
  0x84   : > { %184 = vrot.lane.b32.xlu0 %v180_v21, %s2398_s30 }
  0x85   : > { %582 = vrot.lane.b32.xlu1 %v575_v22, %s2385_s17 }
  0x86   : > { %v634_v26 = vpop.permute.xlu0 %633 }
  0x87   : > { %v2555_v28 = vpop.permute.xlu1 %661 }
  0x88   : > { %663 = vrot.lane.b32.xlu0 %v652_v25, %s2383_s15  ;;  %v667_v29 = vsel %vm665_vm0, %v660_v23, %v2555_v28  ;;  %v183_v25 = vrot.slane %v175_v18, 4 }
  0x89   : > { %673 = vst [vmem:[#allocation2 + $0xe0] sm:$0xf0] %v667_v29  ;;  %526 = vrot.lane.b32.xlu1 %v515_v27, %s2387_s19 }
  0x8a   : > { %v2561_v31 = vpop.permute.xlu0 %635 }
  0x8b   : > { %v641_v32 = vsel %vm639_vm1, %v634_v26, %v2561_v31  ;;  %v658_v35 = vpop.permute.xlu1 %657 }
  0x8c   : > { %647 = vst [vmem:[#allocation2 + $0xe0] sm:$0xf] %v641_v32  ;;  %608 = vrot.lane.b32.xlu0 %v597_v30, %s2386_s18  ;;  %v666_v36 = vsel %vm665_vm0, %v658_v35, %v660_v23  ;;  %v149_v32 = vld [vmem:[%s2429_s14 + $0x18] sm:$0xf] }
  0x8d   : > { %672 = vst [vmem:[#allocation2 + $0xc8] sm:$0xf0] %v666_v36  ;;  %471 = vrot.lane.b32.xlu1 %v460_v33, %s2386_s18 }
  0x8e   : > { %v632_v40 = vpop.permute.xlu0 %631 }
  0x8f   : > { %v640_v42 = vsel %vm639_vm1, %v632_v40, %v634_v26  ;;  %v2575_v43 = vpop.permute.xlu1 %580 }
  0x90   : > { %646 = vst [vmem:[#allocation2 + $0xc8] sm:$0xf] %v640_v42  ;;  %552 = vrot.lane.b32.xlu0 %v541_v37, %s2388_s20 }
  0x91   : > { %445 = vrot.lane.b32.xlu1 %v438_v41, %s2390_s22 }
  0x92   : > { %v579_v46 = vpop.permute.xlu0 %578 }
  0x93   : > { %v586_v47 = vsel %vm584_vm2, %v579_v46, %v2575_v43  ;;  %v703_v48 = vld [vmem:[#allocation2 + $0xe0] sm:$0xff]  ;;  %v2583_v50 = vpop.permute.xlu1 %606 }
  0x94   : > { %592 = vst [vmem:[#allocation2 + $0xd0] sm:$0xf] %v586_v47  ;;  %500 = vrot.lane.b32.xlu0 %v493_v44, %s2389_s21  ;;  %v2586_v51 = vand.u32 4294901760, %v703_v48 }
  0x95   : > { %409 = vrot.lane.b32.xlu1 %v398_v49, %s2392_s24 }
  0x96   : > { %725 = vmatprep.subr.mxu0 %v2586_v51  ;;  %v605_v54 = vpop.permute.xlu0 %604  ;;  %v2592_v55 = vsub.f32 %v703_v48, %v2586_v51 }
  0x97   : > { %v611_v56 = vsel %vm218_vm3, %v605_v54, %v2583_v50  ;;  %v702_v57 = vld [vmem:[#allocation2 + $0xc8] sm:$0xff]  ;;  %v603_v59 = vpop.permute.xlu1 %602 }
  0x98   : > { %617 = vst [vmem:[#allocation2 + $0xd0] sm:$0xf0] %v611_v56  ;;  %383 = vrot.lane.b32.xlu0 %v376_v52, %s2391_s23  ;;  %v2598_v60 = vand.u32 4294901760, %v702_v57  ;;  %v3318_v62 = vand.u32 4294901760, %v2592_v55  ;;  %v610_v63 = vsel %vm218_vm3, %v603_v59, %v605_v54 }
  0x99   : > { %616 = vst [vmem:[#allocation2 + $0x58] sm:$0xf0] %v610_v63  ;;  %354 = vrot.lane.b32.xlu1 %v343_v58, %s2386_s18 }
  0x9a   : > { %727 = vmatpush1.msra.mxu0 %v2598_v60  ;;  %v577_v0 = vpop.permute.xlu0 %576  ;;  %v834_v1 = vsub.f32 %v2592_v55, %v3318_v62  ;;  %v2608_v2 = vsub.f32 %v702_v57, %v2598_v60 }
  0x9b   : > { %v585_v3 = vsel %vm584_vm2, %v577_v0, %v579_v46  ;;  %v2612_v5 = vpop.permute.xlu1 %524 }
  0x9c   : > { %591 = vst [vmem:[#allocation2 + $0x58] sm:$0xf] %v585_v3  ;;  %328 = vrot.lane.b32.xlu0 %v321_v61, %s2393_s25  ;;  %v835_v6 = vand.u32 4294901760, %v834_v1  ;;  %v3317_v7 = vand.u32 4294901760, %v2608_v2 }
  0x9d   : > { %298 = vrot.lane.b32.xlu1 %v287_v4, %s2395_s27 }
  0x9e   : > { %836 = vmatprep.subr.mxu1 %v835_v6  ;;  %v523_v10 = vpop.permute.xlu0 %522  ;;  %v840_v11 = vsub.f32 %v2608_v2, %v3317_v7  ;;  %v145_v7 = vld [vmem:[%s3302_s0 + $0x8] sm:$0xff] }
  0x9f   : > { %v530_v12 = vsel %vm528_vm4, %v523_v10, %v2612_v5  ;;  %v700_v13 = vld [vmem:[#allocation2 + $0xd0] sm:$0xff]  ;;  %v2624_v15 = vpop.permute.xlu1 %550 }
  0xa0   : > { %536 = vst [vmem:[#allocation2 + $0x90] sm:$0xf] %v530_v12  ;;  %272 = vrot.lane.b32.xlu0 %v261_v9, %s2394_s26  ;;  %v2627_v16 = vand.u32 4294901760, %v700_v13  ;;  %v841_v17 = vand.u32 4294901760, %v840_v11 }
  0xa1   : > { %246 = vrot.lane.b32.xlu1 %v239_v14, %s2396_s28 }
  0xa2   : > { %729 = vmatprep.subr.mxu0 %v2627_v16  ;;  %842 = vmatpush1.msra.mxu1 %v841_v17  ;;  %v549_v20 = vpop.permute.xlu0 %548  ;;  %v2633_v21 = vsub.f32 %v700_v13, %v2627_v16 }
  0xa3   : > { %v556_v22 = vsel %vm554_vm5, %v549_v20, %v2624_v15  ;;  %v699_v23 = vld [vmem:[#allocation2 + $0x58] sm:$0xff]  ;;  %v547_v26 = vpop.permute.xlu1 %546 }
  0xa4   : > { %562 = vst [vmem:[#allocation2 + $0x90] sm:$0xf0] %v556_v22  ;;  %216 = vrot.lane.b32.xlu0 %v205_v19, %s2386_s18  ;;  %v2639_v27 = vand.u32 4294901760, %v699_v23  ;;  %v3316_v29 = vand.u32 4294901760, %v2633_v21  ;;  %v555_v30 = vsel %vm554_vm5, %v547_v26, %v549_v20 }
  0xa5   : > { %561 = vst [vmem:[#allocation2 + $0x28] sm:$0xf0] %v555_v30  ;;  %190 = vrot.lane.b32.xlu1 %v183_v25, %s2398_s30 }
  0xa6   : > { %731 = vmatpush1.msra.mxu0 %v2639_v27  ;;  %v521_v33 = vpop.permute.xlu0 %520  ;;  %v846_v34 = vsub.f32 %v2633_v21, %v3316_v29  ;;  %v2649_v35 = vsub.f32 %v699_v23, %v2639_v27 }
  0xa7   : > { %v529_v36 = vsel %vm528_vm4, %v521_v33, %v523_v10  ;;  %v2653_v37 = vpop.permute.xlu1 %469 }
  0xa8   : > { %535 = vst [vmem:[#allocation2 + $0x28] sm:$0xf] %v529_v36  ;;  %160 = vrot.lane.b32.xlu0 %v149_v32, %s2397_s29  ;;  %v847_v38 = vand.u32 4294901760, %v846_v34  ;;  %v3315_v39 = vand.u32 4294901760, %v2649_v35 }
  0xaa   : > { %848 = vmatprep.subr.mxu1 %v847_v38  ;;  %v468_v40 = vpop.permute.xlu0 %467  ;;  %v852_v41 = vsub.f32 %v2649_v35, %v3315_v39 }
  0xab   : > { %v474_v42 = vsel %vm218_vm3, %v468_v40, %v2653_v37  ;;  %v697_v44 = vld [vmem:[#allocation2 + $0x90] sm:$0xff]  ;;  %v2662_v45 = vpop.permute.xlu1 %498 }
  0xac   : > { %480 = vst [vmem:[#allocation2 + $0x10] sm:$0xf] %v474_v42  ;;  %v2664_v46 = vand.u32 4294901760, %v697_v44  ;;  %v853_v47 = vand.u32 4294901760, %v852_v41 }
  0xae   : > { %733 = vmatprep.subr.mxu0 %v2664_v46  ;;  %854 = vmatpush1.msra.mxu1 %v853_v47  ;;  %v497_v48 = vpop.permute.xlu0 %496  ;;  %v2668_v49 = vsub.f32 %v697_v44, %v2664_v46 }
  0xaf   : > { %v504_v52 = vsel %vm502_vm6, %v497_v48, %v2662_v45  ;;  %v696_v53 = vld [vmem:[#allocation2 + $0x28] sm:$0xff]  ;;  %v495_v54 = vpop.permute.xlu1 %494 }
  0xb0   : > { %510 = vst [vmem:[#allocation2 + $0x10] sm:$0xf0] %v504_v52  ;;  %v2672_v56 = vand.u32 4294901760, %v696_v53  ;;  %v3314_v57 = vand.u32 4294901760, %v2668_v49  ;;  %v503_v58 = vsel %vm502_vm6, %v495_v54, %v497_v48 }
  0xb1   : > { %509 = vst [vmem:[#allocation2 + $0xc0] sm:$0xf0] %v503_v58 }
  0xb2   : > { %735 = vmatpush1.msra.mxu0 %v2672_v56  ;;  %v466_v59 = vpop.permute.xlu0 %465  ;;  %v858_v61 = vsub.f32 %v2668_v49, %v3314_v57  ;;  %v2681_v63 = vsub.f32 %v696_v53, %v2672_v56 }
  0xb3   : > { %v473_v0 = vsel %vm218_vm3, %v466_v59, %v468_v40  ;;  %v2684_v1 = vpop.permute.xlu1 %443 }
  0xb4   : > { %479 = vst [vmem:[#allocation2 + $0xc0] sm:$0xf] %v473_v0  ;;  %v859_v3 = vand.u32 4294901760, %v858_v61  ;;  %v3313_v4 = vand.u32 4294901760, %v2681_v63 }
  0xb6   : > { %860 = vmatprep.subr.mxu1 %v859_v3  ;;  %v442_v6 = vpop.permute.xlu0 %441  ;;  %v864_v8 = vsub.f32 %v2681_v63, %v3313_v4 }
  0xb7   : > { %v449_v9 = vsel %vm447_vm7, %v442_v6, %v2684_v1  ;;  %v694_v10 = vld [vmem:[#allocation2 + $0x10] sm:$0xff]  ;;  %v380_v11 = vpop.permute.xlu1 %379 }
  0xb8   : > { %455 = vst [vmem:[#allocation2 + $0x8] sm:$0xf0] %v449_v9  ;;  %v2692_v12 = vand.u32 4294901760, %v694_v10  ;;  %v865_v13 = vand.u32 4294901760, %v864_v8 }
  0xba   : > { %737 = vmatprep.subr.mxu0 %v2692_v12  ;;  %866 = vmatpush1.msra.mxu1 %v865_v13  ;;  %v440_v14 = vpop.permute.xlu0 %439  ;;  %v2696_v17 = vsub.f32 %v694_v10, %v2692_v12 }
  0xbb   : > { %v448_v18 = vsel %vm447_vm7, %v440_v14, %v442_v6  ;;  %v693_v19 = vld [vmem:[#allocation2 + $0xc0] sm:$0xff]  ;;  %v406_v20 = vpop.permute.xlu1 %405 }
  0xbc   : > { %454 = vst [vmem:[#allocation2 + $0x40] sm:$0xf0] %v448_v18  ;;  %v2699_v22 = vand.u32 4294901760, %v693_v19  ;;  %v3311_v23 = vand.u32 4294901760, %v2696_v17 }
  0xbe   : > { %739 = vmatpush1.msra.mxu0 %v2699_v22  ;;  %v2703_v25 = vpop.permute.xlu0 %381  ;;  %v870_v26 = vsub.f32 %v2696_v17, %v3311_v23  ;;  %v2709_v30 = vsub.f32 %v693_v19, %v2699_v22 }
  0xbf   : > { %v387_v32 = vsel %vm385_vm8, %v380_v11, %v2703_v25  ;;  %v691_v33 = vld [vmem:[#allocation2 + $0x8] sm:$0xff]  ;;  %v378_v34 = vpop.permute.xlu1 %377 }
  0xc0   : > { %393 = vst [vmem:[#allocation2 + $0xa8] sm:$0xf] %v387_v32  ;;  %v2713_v36 = vand.u32 4294901760, %v691_v33  ;;  %v871_v38 = vand.u32 4294901760, %v870_v26  ;;  %v3310_v40 = vand.u32 4294901760, %v2709_v30  ;;  %v386_v41 = vsel %vm385_vm8, %v378_v34, %v380_v11 }
  0xc1   : > { %392 = vst [vmem:[#allocation2 + $0x60] sm:$0xf] %v386_v41 }
  0xc2   : > { %741 = vmatprep.subr.mxu0 %v2713_v36  ;;  %872 = vmatprep.subr.mxu1 %v871_v38  ;;  %v2718_v42 = vpop.permute.xlu0 %407  ;;  %v876_v44 = vsub.f32 %v2709_v30, %v3310_v40  ;;  %v2724_v47 = vsub.f32 %v691_v33, %v2713_v36 }
  0xc3   : > { %v413_v48 = vsel %vm411_vm9, %v406_v20, %v2718_v42  ;;  %v690_v52 = vld [vmem:[#allocation2 + $0x40] sm:$0xff]  ;;  %v325_v53 = vpop.permute.xlu1 %324 }
  0xc4   : > { %419 = vst [vmem:[#allocation2 + $0xa8] sm:$0xf0] %v413_v48  ;;  %v2728_v54 = vand.u32 4294901760, %v690_v52  ;;  %v877_v58 = vand.u32 4294901760, %v876_v44  ;;  %v3308_v59 = vand.u32 4294901760, %v2724_v47 }
  0xc6   : > { %743 = vmatpush1.msra.mxu0 %v2728_v54  ;;  %878 = vmatpush1.msra.mxu1 %v877_v58  ;;  %v404_v61 = vpop.permute.xlu0 %403  ;;  %v882_v0 = vsub.f32 %v2724_v47, %v3308_v59  ;;  %v2736_v3 = vsub.f32 %v690_v52, %v2728_v54 }
  0xc7   : > { %v412_v6 = vsel %vm411_vm9, %v404_v61, %v406_v20  ;;  %v351_v8 = vpop.permute.xlu1 %350 }
  0xc8   : > { %418 = vst [vmem:[#allocation2 + $0x60] sm:$0xf0] %v412_v6  ;;  %v883_v9 = vand.u32 4294901760, %v882_v0  ;;  %v3307_v10 = vand.u32 4294901760, %v2736_v3 }
  0xca   : > { %884 = vmatprep.subr.mxu1 %v883_v9  ;;  %v2740_v11 = vpop.permute.xlu0 %326  ;;  %v888_v13 = vsub.f32 %v2736_v3, %v3307_v10 }
  0xcb   : > { %v332_v14 = vsel %vm330_vm10, %v325_v53, %v2740_v11  ;;  %v688_v18 = vld [vmem:[#allocation2 + $0xa8] sm:$0xff]  ;;  %v323_v19 = vpop.permute.xlu1 %322 }
  0xcc   : > { %338 = vst [vmem:[#allocation2 + $0xe8] sm:$0xf] %v332_v14  ;;  %v2747_v20 = vand.u32 4294901760, %v688_v18  ;;  %v889_v26 = vand.u32 4294901760, %v888_v13  ;;  %v331_v32 = vsel %vm330_vm10, %v323_v19, %v325_v53 }
  0xcd   : > { %337 = vst [vmem:[#allocation2 + $0x88] sm:$0xf] %v331_v32 }
  0xce   : > { %745 = vmatprep.subr.mxu0 %v2747_v20  ;;  %890 = vmatpush1.msra.mxu1 %v889_v26  ;;  %v2751_v33 = vpop.permute.xlu0 %352  ;;  %v2754_v34 = vsub.f32 %v688_v18, %v2747_v20 }
  0xcf   : > { %v357_v38 = vsel %vm218_vm3, %v351_v8, %v2751_v33  ;;  %v687_v41 = vld [vmem:[#allocation2 + $0x60] sm:$0xff]  ;;  %v269_v44 = vpop.permute.xlu1 %268 }
  0xd0   : > { %363 = vst [vmem:[#allocation2 + $0xe8] sm:$0xf0] %v357_v38  ;;  %v2758_v48 = vand.u32 4294901760, %v687_v41  ;;  %v3306_v52 = vand.u32 4294901760, %v2754_v34 }
  0xd2   : > { %747 = vmatpush1.msra.mxu0 %v2758_v48  ;;  %v349_v53 = vpop.permute.xlu0 %348  ;;  %v894_v58 = vsub.f32 %v2754_v34, %v3306_v52  ;;  %v2766_v61 = vsub.f32 %v687_v41, %v2758_v48 }
  0xd3   : > { %v356_v0 = vsel %vm218_vm3, %v349_v53, %v351_v8  ;;  %v295_v6 = vpop.permute.xlu1 %294 }
  0xd4   : > { %362 = vst [vmem:[#allocation2 + $0x88] sm:$0xf0] %v356_v0  ;;  %v895_v9 = vand.u32 4294901760, %v894_v58  ;;  %v3305_v13 = vand.u32 4294901760, %v2766_v61 }
  0xd6   : > { %896 = vmatprep.subr.mxu1 %v895_v9  ;;  %v2770_v14 = vpop.permute.xlu0 %270  ;;  %v900_v18 = vsub.f32 %v2766_v61, %v3305_v13 }
  0xd7   : > { %v276_v19 = vsel %vm274_vm11, %v269_v44, %v2770_v14  ;;  %v685_v26 = vld [vmem:[#allocation2 + $0xe8] sm:$0xff]  ;;  %v267_v32 = vpop.permute.xlu1 %266 }
  0xd8   : > { %282 = vst [vmem:[#allocation2 + $0x48] sm:$0xf] %v276_v19  ;;  %v2777_v8 = vand.u32 4294901760, %v685_v26  ;;  %v901_v38 = vand.u32 4294901760, %v900_v18  ;;  %v275_v41 = vsel %vm274_vm11, %v267_v32, %v269_v44 }
  0xd9   : > { %281 = vst [vmem:[#allocation2 + $0x30] sm:$0xf] %v275_v41 }
  0xda   : > { %749 = vmatprep.subr.mxu0 %v2777_v8  ;;  %902 = vmatpush1.msra.mxu1 %v901_v38  ;;  %v2781_v53 = vpop.permute.xlu0 %296  ;;  %v2784_v58 = vsub.f32 %v685_v26, %v2777_v8 }
  0xdb   : > { %v302_v0 = vsel %vm300_vm12, %v295_v6, %v2781_v53  ;;  %v684_v9 = vld [vmem:[#allocation2 + $0x88] sm:$0xff]  ;;  %v213_v19 = vpop.permute.xlu1 %212 }
  0xdc   : > { %308 = vst [vmem:[#allocation2 + $0x48] sm:$0xf0] %v302_v0  ;;  %v2788_v13 = vand.u32 4294901760, %v684_v9  ;;  %v3309_v18 = vand.u32 4294901760, %v2784_v58 }
  0xde   : > { %3338 = vst [vmem:[#allocation3_spill] sm:$0xff] %v2788_v13  ;;  %751 = vmatpush1.msra.mxu0 %v2788_v13  ;;  %v293_v44 = vpop.permute.xlu0 %292  ;;  %v906_v32 = vsub.f32 %v2784_v58, %v3309_v18  ;;  %v2796_v26 = vsub.f32 %v684_v9, %v2788_v13 }
  0xdf   : > { %v301_v38 = vsel %vm300_vm12, %v293_v44, %v295_v6  ;;  %v243_v41 = vpop.permute.xlu1 %242 }
  0xe0   : > { %307 = vst [vmem:[#allocation2 + $0x30] sm:$0xf0] %v301_v38  ;;  %v907_v0 = vand.u32 4294901760, %v906_v32  ;;  %v3312_v52 = vand.u32 4294901760, %v2796_v26 }
  0xe2   : > { %908 = vmatprep.subr.mxu1 %v907_v0  ;;  %v2800_v10 = vpop.permute.xlu0 %214  ;;  %v912_v59 = vsub.f32 %v2796_v26, %v3312_v52 }
  0xe3   : > { %v220_v18 = vsel %vm218_vm3, %v213_v19, %v2800_v10  ;;  %v682_v40 = vld [vmem:[#allocation2 + $0x48] sm:$0xff]  ;;  %v211_v9 = vpop.permute.xlu1 %210 }
  0xe4   : > { %226 = vst [vmem:[#allocation2 + $0x50] sm:$0xf] %v220_v18  ;;  %v2807_v23 = vand.u32 4294901760, %v682_v40  ;;  %v913_v6 = vand.u32 4294901760, %v912_v59  ;;  %v219_v44 = vsel %vm218_vm3, %v211_v9, %v213_v19  ;;  %v144_v19 = vld [vmem:[%s3302_s0] sm:$0xff] }
  0xe5   : > { %225 = vst [vmem:[#allocation2 + $0x18] sm:$0xf] %v219_v44  ;;  %v707_v29 = vsel %vm705_vm14, %v144_v19, 0 }
  0xe6   : > { %3339 = vst [vmem:[#allocation4_spill] sm:$0xff] %v2807_v23  ;;  %753 = vmatprep.subr.mxu0 %v2807_v23  ;;  %914 = vmatpush1.msra.mxu1 %v913_v6  ;;  %v2811_v32 = vpop.permute.xlu0 %244  ;;  %v2814_v38 = vsub.f32 %v682_v40, %v2807_v23 }
  0xe7   : > { %v250_v0 = vsel %vm3320_vm13, %v243_v41, %v2811_v32  ;;  %v681_v18 = vld [vmem:[#allocation2 + $0x30] sm:$0xff]  ;;  %v157_v52 = vpop.permute.xlu1 %156 }
  0xe8   : > { %256 = vst [vmem:[#allocation2 + $0x50] sm:$0xf0] %v250_v0  ;;  %v2818_v4 = vand.u32 4294901760, %v681_v18  ;;  %v3319_v59 = vand.u32 4294901760, %v2814_v38 }
  0xea   : > { %3340 = vst [vmem:[#allocation5_spill] sm:$0xff] %v2818_v4  ;;  %755 = vmatpush1.msra.mxu0 %v2818_v4  ;;  %v241_v9 = vpop.permute.xlu0 %240  ;;  %v918_v40 = vsub.f32 %v2814_v38, %v3319_v59  ;;  %v2829_v6 = vsub.f32 %v681_v18, %v2818_v4 }
  0xeb   : > { %v249_v44 = vsel %vm3320_vm13, %v241_v9, %v243_v41  ;;  %v187_v0 = vpop.permute.xlu1 %186  ;;  %vm192_vm13 = vcmask 711680  }
  0xec   : > { %255 = vst [vmem:[#allocation2 + $0x18] sm:$0xf0] %v249_v44  ;;  %v919_v57 = vand.u32 4294901760, %v918_v40  ;;  %v3323_v39 = vand.u32 4294901760, %v2829_v6  ;;  %v2844_v40 = vand.u32 4294901760, %v707_v29 }
  0xee   : > { %920 = vmatprep.subr.mxu1 %v919_v57  ;;  %v2837_v62 = vpop.permute.xlu0 %158  ;;  %v924_v18 = vsub.f32 %v2829_v6, %v3323_v39  ;;  %v710_v57 = vsel %vm705_vm14, %v145_v7, 0 }
  0xef   : > { %3341 = vst [vmem:[#allocation6_spill] sm:$0xff] %v2837_v62  ;;  %v164_v41 = vsel %vm162_vm15, %v157_v52, %v2837_v62  ;;  %v679_v9 = vld [vmem:[#allocation2 + $0x50] sm:$0xff]  ;;  %v155_v44 = vpop.permute.xlu1 %154  ;;  %v2861_v23 = vand.u32 4294901760, %v710_v57 }
  0xf0   : > { %170 = vst [vmem:[#allocation2] sm:$0xf] %v164_v41  ;;  %v2846_v19 = vand.u32 4294901760, %v679_v9  ;;  %v925_v59 = vand.u32 4294901760, %v924_v18  ;;  %v163_v24 = vsel %vm162_vm15, %v155_v44, %v157_v52  ;;  %v2859_v18 = vsub.f32 %v707_v29, %v2844_v40 }
  0xf1   : > { %169 = vst [vmem:[#allocation2 + $0xb0] sm:$0xf] %v163_v24 }
  0xf2   : > { %3342 = vst [vmem:[#allocation7_spill] sm:$0xff] %v2846_v19  ;;  %757 = vmatprep.subr.mxu0 %v2846_v19  ;;  %926 = vmatpush1.msra.mxu1 %v925_v59  ;;  %v2851_v39 = vpop.permute.xlu0 %188  ;;  %v2854_v4 = vsub.f32 %v679_v9, %v2846_v19  ;;  %v2877_v19 = vand.u32 4294901760, %v2859_v18 }
  0xf3   : > { %3343 = vst [vmem:[#allocation8_spill] sm:$0xff] %v2851_v39  ;;  %v194_v41 = vsel %vm192_vm13, %v187_v0, %v2851_v39  ;;  %v678_v62 = vld [vmem:[#allocation2 + $0x18] sm:$0xff]  ;;  %v638_v7 = vpop.permute.xlu1 %637  ;;  %v2880_v39 = vsub.f32 %v710_v57, %v2861_v23 }
  0xf4   : > { %200 = vst [vmem:[#allocation2] sm:$0xf0] %v194_v41  ;;  %v2863_v24 = vand.u32 4294901760, %v678_v62  ;;  %v3334_v52 = vand.u32 4294901760, %v2854_v4  ;;  %v642_v59 = vsel %vm639_vm1, %v2561_v31, %v638_v7  ;;  %3344 = vst [vmem:[#allocation9_spill] sm:$0xff] %v2877_v19  ;;  %vm2068_vm1 = vcmask 523264  }
  0xf5   : > { %648 = vst [vmem:[#allocation2 + $0x20] sm:$0xf] %v642_v59 }
  0xf6   : > { %759 = vmatpush1.msra.mxu0 %v2863_v24  ;;  %v185_v9 = vpop.permute.xlu0 %184  ;;  %v930_v29 = vsub.f32 %v2854_v4, %v3334_v52  ;;  %v2873_v44 = vsub.f32 %v678_v62, %v2863_v24 }
  0xf7   : > { %v193_v41 = vsel %vm192_vm13, %v185_v9, %v187_v0  ;;  %v583_v31 = vpop.permute.xlu1 %582 }
  0xf8   : > { %199 = vst [vmem:[#allocation2 + $0xb0] sm:$0xf0] %v193_v41  ;;  %v931_v7 = vand.u32 4294901760, %v930_v29  ;;  %v3335_v59 = vand.u32 4294901760, %v2873_v44  ;;  %v587_v13 = vsel %vm584_vm2, %v2575_v43, %v583_v31  ;;  %v800_v41 = vsub.f32 %v2859_v18, %v2877_v19 }
  0xf9   : > { %593 = vst [vmem:[#allocation2 + $0x98] sm:$0xf] %v587_v13  ;;  %v2893_v29 = vand.u32 4294901760, %v2880_v39 }
  0xfa   : > { %932 = vmatprep.subr.mxu1 %v931_v7  ;;  %v664_v62 = vpop.permute.xlu0 %663  ;;  %v936_v0 = vsub.f32 %v2873_v44, %v3335_v59 }
  0xfb   : > { %v668_v9 = vsel %vm665_vm0, %v2555_v28, %v664_v62  ;;  %v676_v57 = vld [vmem:[#allocation2] sm:$0xff]  ;;  %v527_v52 = vpop.permute.xlu1 %526  ;;  %vm3346_vm0 = vcmask 695296  }
  0xfc   : > { %674 = vst [vmem:[#allocation2 + $0x20] sm:$0xf0] %v668_v9  ;;  %v937_v43 = vand.u32 4294901760, %v936_v0  ;;  %v2895_v13 = vand.u32 4294901760, %v676_v57  ;;  %v531_v31 = vsel %vm528_vm4, %v2612_v5, %v527_v52  ;;  %v2905_v9 = vand.u32 4294901760, %v800_v41 }
  0xfd   : > { %537 = vst [vmem:[#allocation2 + $0xa0] sm:$0xf] %v531_v31  ;;  %v811_v0 = vsub.f32 %v2880_v39, %v2893_v29 }
  0xfe   : > { %938 = vmatpush1.msra.mxu1 %v937_v43  ;;  %v609_v7 = vpop.permute.xlu0 %608  ;;  %761 = vmatprep.subr.mxu0 %v2895_v13  ;;  %v2901_v28 = vsub.f32 %v676_v57, %v2895_v13 }
  0xff   : > { %v612_v62 = vsel %vm218_vm3, %v2583_v50, %v609_v7  ;;  %v675_v59 = vld [vmem:[#allocation2 + $0xb0] sm:$0xff]  ;;  %v472_v19 = vpop.permute.xlu1 %471  ;;  %v2925_v7 = vand.u32 4294901760, %v811_v0 }
 0x100   : > { %618 = vst [vmem:[#allocation2 + $0x98] sm:$0xf0] %v612_v62  ;;  %v2909_v5 = vand.u32 4294901760, %v675_v59  ;;  %v941_v52 = vand.u32 4294901760, %v2901_v28  ;;  %v475_v43 = vsel %vm218_vm3, %v2653_v37, %v472_v19 }
 0x101   : > { %481 = vst [vmem:[#allocation2 + $0x38] sm:$0xf] %v475_v43  ;;  %v3345_v43 = vmov 0.0  }
 0x102   : > { %v553_v57 = vpop.permute.xlu0 %552  ;;  %763 = vmatpush1.msra.mxu0 %v2909_v5  ;;  %v942_v50 = vsub.f32 %v2901_v28, %v941_v52  ;;  %v2919_v41 = vsub.f32 %v675_v59, %v2909_v5 }
 0x103   : > { %v557_v31 = vsel %vm554_vm5, %v2624_v15, %v553_v57  ;;  %1012 = vmatprep.subr.mxu0 %v2592_v55  ;;  %802 = vmatmul.mubr.f32.vlgmr.msra.gmra.mxu0 %v2905_v9  ;;  %v446_v37 = vpop.permute.xlu1 %445 }
 0x104   : > { %563 = vst [vmem:[#allocation2 + $0xa0] sm:$0xf0] %v557_v31  ;;  %1015 = vmatpush1.msra.mxu0 %v2608_v2  ;;  %v943_v19 = vand.u32 4294901760, %v942_v50  ;;  %v947_v62 = vand.u32 4294901760, %v2919_v41  ;;  %807 = vmatprep.mubr.f32.mxu0 %v3345_v43  ;;  %v450_v59 = vsel %vm447_vm7, %v2684_v1, %v446_v37 }
 0x105   : > { %1018 = vmatprep.subr.mxu0 %v2633_v21  ;;  %456 = vst [vmem:[#allocation2 + $0x78] sm:$0xf0] %v450_v59 }
 0x106   : > { %v501_v15 = vpop.permute.xlu0 %500  ;;  %944 = vmatprep.subr.mxu1 %v943_v19  ;;  %1021 = vmatpush1.msra.mxu0 %v2649_v35  ;;  %v948_v0 = vsub.f32 %v2919_v41, %v947_v62 }
 0x107   : > { %v505_v57 = vsel %vm502_vm6, %v2662_v45, %v501_v15  ;;  %1024 = vmatprep.subr.mxu0 %v2668_v49  ;;  %813 = vmatmul.mubr.f32.gmra.mxu0 %v2925_v7  ;;  %v410_v1 = vpop.permute.xlu1 %409 }
 0x108   : > { %511 = vst [vmem:[#allocation2 + $0x38] sm:$0xf0] %v505_v57  ;;  %1027 = vmatpush1.msra.mxu0 %v2681_v63  ;;  %v949_v50 = vand.u32 4294901760, %v948_v0  ;;  %1102 = vmatprep.mubr.f32.mxu0 %v3345_v43  ;;  %v414_v31 = vsel %vm411_vm9, %v2718_v42, %v410_v1 }
 0x109   : > { %1030 = vmatprep.subr.mxu0 %v2696_v17  ;;  %420 = vst [vmem:[#allocation2 + $0x70] sm:$0xf0] %v414_v31  ;;  %v3348_v31 = vld [vmem:[#allocation3_spill] sm:$0xff] }
 0x10a   : > { %v384_v37 = vpop.permute.xlu0 %383  ;;  %950 = vmatpush1.msra.mxu1 %v949_v50  ;;  %1033 = vmatpush1.msra.mxu0 %v2709_v30 }
 0x10b   : > { %v388_v45 = vsel %vm385_vm8, %v2703_v25, %v384_v37  ;;  %985 = vmatmul.mubr.f32.vlgmr.msra.gmra.mxu1 %v2844_v40  ;;  %1036 = vmatprep.subr.mxu0 %v2724_v47  ;;  %v355_v42 = vpop.permute.xlu1 %354  ;;  %v3349_v37 = vand.u32 4294901760, %v2608_v2  ;;  %v3355_v2 = vand.u32 4294901760, %v2649_v35  ;;  %v3360_v35 = vand.u32 4294901760, %v2709_v30 }
 0x10c   : > { %394 = vst [vmem:[#allocation2 + $0x70] sm:$0xf] %v388_v45  ;;  %1132 = vmatprep.subr.mxu1 %v2586_v51  ;;  %1039 = vmatpush1.msra.mxu0 %v2736_v3  ;;  %v358_v19 = vsel %vm218_vm3, %v2751_v33, %v355_v42  ;;  %v3365_v30 = vand.u32 4294901760, %v2766_v61 }
 0x10d   : > { %1134 = vmatpush1.msra.mxu1 %v2598_v60  ;;  %1042 = vmatprep.subr.mxu0 %v2754_v34  ;;  %364 = vst [vmem:[#allocation2 + $0xb8] sm:$0xf0] %v358_v19  ;;  %v3351_v19 = vld [vmem:[#allocation4_spill] sm:$0xff] }
 0x10e   : > { %1136 = vmatprep.subr.mxu1 %v2627_v16  ;;  %v329_v25 = vpop.permute.xlu0 %328  ;;  %1045 = vmatpush1.msra.mxu0 %v2766_v61  ;;  %v3370_v61 = vand.u32 4294901760, %v2854_v4 }
 0x10f   : > { %v333_v59 = vsel %vm330_vm10, %v2740_v11, %v329_v25  ;;  %1138 = vmatpush1.msra.mxu1 %v2639_v27  ;;  %1048 = vmatprep.subr.mxu0 %v2784_v58  ;;  %v299_v33 = vpop.permute.xlu1 %298  ;;  %v3352_v25 = vand.u32 4294901760, %v2633_v21  ;;  %v3358_v21 = vand.u32 4294901760, %v2681_v63  ;;  %v3363_v63 = vand.u32 4294901760, %v2736_v3 }
 0x110   : > { %339 = vst [vmem:[#allocation2 + $0xb8] sm:$0xf] %v333_v59  ;;  %1140 = vmatprep.subr.mxu1 %v2664_v46  ;;  %1051 = vmatpush1.msra.mxu0 %v2796_v26  ;;  %v303_v15 = vsel %vm300_vm12, %v2781_v53, %v299_v33  ;;  %v3354_v33 = vld [vmem:[#allocation5_spill] sm:$0xff]  ;;  %v3368_v3 = vand.u32 4294901760, %v2814_v38 }
 0x111   : > { %1142 = vmatpush1.msra.mxu1 %v2672_v56  ;;  %1054 = vmatprep.subr.mxu0 %v2814_v38  ;;  %309 = vst [vmem:[#allocation2 + $0x80] sm:$0xf0] %v303_v15  ;;  %v3356_v15 = vld [vmem:[#allocation7_spill] sm:$0xff] }
 0x112   : > { %1144 = vmatprep.subr.mxu1 %v2692_v12  ;;  %v273_v11 = vpop.permute.xlu0 %272  ;;  %1057 = vmatpush1.msra.mxu0 %v2829_v6 }
 0x113   : > { %v277_v0 = vsel %vm274_vm11, %v2770_v14, %v273_v11  ;;  %1146 = vmatpush1.msra.mxu1 %v2699_v22  ;;  %1060 = vmatprep.subr.mxu0 %v2854_v4  ;;  %v247_v53 = vpop.permute.xlu1 %246  ;;  %v3357_v11 = vand.u32 4294901760, %v2668_v49  ;;  %v3362_v49 = vand.u32 4294901760, %v2724_v47  ;;  %v3367_v47 = vand.u32 4294901760, %v2796_v26  ;;  %v692_v4 = vld [vmem:[#allocation2 + $0x78] sm:$0xff]  ;;  %v689_v26 = vld [vmem:[#allocation2 + $0x70] sm:$0xff] }
 0x114   : > { %283 = vst [vmem:[#allocation2 + $0x80] sm:$0xf] %v277_v0  ;;  %1148 = vmatprep.subr.mxu1 %v2713_v36  ;;  %1063 = vmatpush1.msra.mxu0 %v2873_v44  ;;  %v251_v57 = vsel %vm3346_vm0, %v2811_v32, %v247_v53  ;;  %v3347_v32 = vand.u32 4294901760, %v2592_v55  ;;  %v3353_v55 = vld [vmem:[#allocation6_spill] sm:$0xff]  ;;  %v3359_v0 = vand.u32 4294901760, %v2696_v17  ;;  %v3361_v53 = vld [vmem:[#allocation9_spill] sm:$0xff] }
 0x115   : > { %1150 = vmatpush1.msra.mxu1 %v2728_v54  ;;  %1066 = vmatprep.subr.mxu0 %v2901_v28  ;;  %257 = vst [vmem:[#allocation2 + $0x68] sm:$0xf0] %v251_v57  ;;  %v3364_v17 = vand.u32 4294901760, %v2754_v34  ;;  %v704_v57 = vld [vmem:[#allocation2 + $0x20] sm:$0xff]  ;;  %v3082_v38 = vand.u32 4294901760, %v692_v4 }
 0x116   : > { %1152 = vmatprep.subr.mxu1 %v2747_v20  ;;  %v217_v14 = vpop.permute.xlu0 %216  ;;  %1069 = vmatpush1.msra.mxu0 %v2919_v41 }
 0x117   : > { %v221_v1 = vsel %vm218_vm3, %v2800_v10, %v217_v14  ;;  %1154 = vmatpush1.msra.mxu1 %v2758_v48  ;;  %990 = vmatprep.mubr.f32.mxu1 %v3345_v43  ;;  %v191_v50 = vpop.permute.xlu1 %190  ;;  %v3350_v10 = vld [vmem:[#allocation8_spill] sm:$0xff] }
 0x118   : > { %227 = vst [vmem:[#allocation2 + $0x68] sm:$0xf] %v221_v1  ;;  %1105 = vmatmul.mubr.f32.vlgmr.msra.gmra.mxu0 %v2859_v18  ;;  %1156 = vmatprep.subr.mxu1 %v2777_v8  ;;  %v195_v45 = vsel %vm192_vm13, %v3350_v10, %v191_v50  ;;  %v3111_v1 = vsub.f32 %v692_v4, %v3082_v38 }
 0x119   : > { %1237 = vmatprep.subr.mxu0 %v3347_v32  ;;  %992 = vmatmul.mubr.f32.gmra.mxu1 %v2861_v23  ;;  %201 = vst [vmem:[#allocation2 + $0xd8] sm:$0xf0] %v195_v45 }
 0x11a   : > { %1158 = vmatpush1.msra.mxu1 %v3348_v31  ;;  %1241 = vmatpush1.msra.mxu0 %v3349_v37  ;;  %v161_v42 = vpop.permute.xlu0 %160  ;;  %v3134_v45 = vand.u32 4294901760, %v3111_v1 }
 0x11b   : > { %1160 = vmatprep.subr.mxu1 %v3351_v19  ;;  %1245 = vmatprep.subr.mxu0 %v3352_v25  ;;  %v165_v59 = vsel %vm162_vm15, %v3353_v55, %v161_v42  ;;  %v683_v14 = vld [vmem:[#allocation2 + $0x80] sm:$0xff] }
 0x11c   : > { %171 = vst [vmem:[#allocation2 + $0xd8] sm:$0xf] %v165_v59  ;;  %1110 = vmatprep.mubr.f32.mxu0 %v3345_v43  ;;  %1162 = vmatpush1.msra.mxu1 %v3354_v33  ;;  %v3127_v10 = vand.u32 4294901760, %v683_v14 }
 0x11d   : > { %1249 = vmatpush1.msra.mxu0 %v3355_v2  ;;  %1164 = vmatprep.subr.mxu1 %v3356_v15 }
 0x11e   : > { %1113 = vmatmul.mubr.f32.gmra.mxu0 %v2880_v39  ;;  %1253 = vmatprep.subr.mxu0 %v3357_v11  ;;  %v3152_v2 = vsub.f32 %v683_v14, %v3127_v10  ;;  %v1599_v11 = vsub.f32 %v3111_v1, %v3134_v45 }
 0x11f   : > { %1166 = vmatpush1.msra.mxu1 %v2863_v24  ;;  %1257 = vmatpush1.msra.mxu0 %v3358_v21 }
 0x120   : > { %1168 = vmatprep.subr.mxu1 %v2895_v13  ;;  %1261 = vmatprep.subr.mxu0 %v3359_v0 }
 0x121   : > { %1170 = vmatpush1.msra.mxu1 %v2909_v5  ;;  %1203 = vmatprep.mubr.f32.mxu1 %v3345_v43 }
 0x122   : > { %1265 = vmatpush1.msra.mxu0 %v3360_v35  ;;  %1207 = vmatmul.mubr.f32.vlgmr.msra.gmra.mxu1 %v3361_v53 }
 0x123   : > { %1269 = vmatprep.subr.mxu0 %v3362_v49  ;;  %1374 = vmatprep.subr.mxu1 %v2586_v51  ;;  %v3366_v51 = vand.u32 4294901760, %v2784_v58  ;;  %v695_v58 = vld [vmem:[#allocation2 + $0x38] sm:$0xff]  ;;  %v3170_v49 = vand.u32 4294901760, %v3152_v2 }
 0x124   : > { %1273 = vmatpush1.msra.mxu0 %v3363_v63  ;;  %1376 = vmatpush1.msra.mxu1 %v2598_v60  ;;  %v701_v60 = vld [vmem:[#allocation2 + $0x98] sm:$0xff] }
 0x125   : > { %1277 = vmatprep.subr.mxu0 %v3364_v17  ;;  %1378 = vmatprep.subr.mxu1 %v2627_v16  ;;  %v3041_v16 = vand.u32 4294901760, %v704_v57  ;;  %v3049_v34 = vand.u32 4294901760, %v701_v60  ;;  %v677_v42 = vld [vmem:[#allocation2 + $0xd8] sm:$0xff]  ;;  %v1600_v17 = vand.u32 4294901760, %v1599_v11 }
 0x126   : > { %1212 = vmatprep.mubr.f32.mxu1 %v3345_v43  ;;  %1281 = vmatpush1.msra.mxu0 %v3365_v30 }
 0x127   : > { %1380 = vmatpush1.msra.mxu1 %v2639_v27  ;;  %1285 = vmatprep.subr.mxu0 %v3366_v51  ;;  %v3369_v27 = vand.u32 4294901760, %v2829_v6  ;;  %v686_v6 = vld [vmem:[#allocation2 + $0xb8] sm:$0xff] }
 0x128   : > { %1216 = vmatmul.mubr.f32.gmra.mxu1 %v2893_v29  ;;  %1382 = vmatprep.subr.mxu1 %v2664_v46  ;;  %v698_v46 = vld [vmem:[#allocation2 + $0xa0] sm:$0xff]  ;;  %v3105_v41 = vand.u32 4294901760, %v686_v6 }
 0x129   : > { %1289 = vmatpush1.msra.mxu0 %v3367_v47  ;;  %1384 = vmatpush1.msra.mxu1 %v2672_v56  ;;  %v3371_v56 = vand.u32 4294901760, %v2873_v44  ;;  %v3094_v44 = vand.u32 4294901760, %v689_v26 }
 0x12a   : > { %1293 = vmatprep.subr.mxu0 %v3368_v3  ;;  %1386 = vmatprep.subr.mxu1 %v2692_v12  ;;  %v3058_v12 = vsub.f32 %v704_v57, %v3041_v16 }
 0x12b   : > { %1297 = vmatpush1.msra.mxu0 %v3369_v27  ;;  %1388 = vmatpush1.msra.mxu1 %v2699_v22  ;;  %v3063_v22 = vand.u32 4294901760, %v698_v46  ;;  %v3123_v37 = vsub.f32 %v689_v26, %v3094_v44 }
 0x12c   : > { %1301 = vmatprep.subr.mxu0 %v3370_v61  ;;  %1390 = vmatprep.subr.mxu1 %v2713_v36  ;;  %v3069_v36 = vsub.f32 %v701_v60, %v3049_v34  ;;  %v1620_v60 = vsub.f32 %v3152_v2, %v3170_v49 }
 0x12d   : > { %1305 = vmatpush1.msra.mxu0 %v3371_v56  ;;  %1392 = vmatpush1.msra.mxu1 %v2728_v54  ;;  %v3073_v54 = vand.u32 4294901760, %v695_v58  ;;  %v3146_v59 = vand.u32 4294901760, %v3123_v37 }
 0x12e   : > { %1309 = vmatprep.subr.mxu0 %v941_v52  ;;  %1394 = vmatprep.subr.mxu1 %v2747_v20  ;;  %v3078_v20 = vand.u32 4294901760, %v3058_v12 }
 0x12f   : > { %1313 = vmatpush1.msra.mxu0 %v947_v62  ;;  %1346 = vmatprep.mubr.f32.mxu0 %v3345_v43  ;;  %v3097_v28 = vsub.f32 %v695_v58, %v3073_v54 }
 0x130   : > { %1396 = vmatpush1.msra.mxu1 %v2758_v48  ;;  %1348 = vmatmul.mubr.f32.vlgmr.msra.gmra.mxu0 %v2844_v40  ;;  %v3085_v48 = vsub.f32 %v698_v46, %v3063_v22  ;;  %v1571_v52 = vsub.f32 %v3058_v12, %v3078_v20  ;;  %v1621_v46 = vand.u32 4294901760, %v1620_v60 }
 0x131   : > { %1398 = vmatprep.subr.mxu1 %v2777_v8  ;;  %2211 = vmatprep.subr.mxu0 %v3041_v16  ;;  %v3090_v8 = vand.u32 4294901760, %v3069_v36  ;;  %v3120_v50 = vand.u32 4294901760, %v3097_v28 }
 0x132   : > { %1400 = vmatpush1.msra.mxu1 %v3348_v31  ;;  %2212 = vmatpush3.msra.mxu0 %v3041_v16  ;;  %v3108_v62 = vand.u32 4294901760, %v3085_v48  ;;  %v680_v31 = vld [vmem:[#allocation2 + $0x68] sm:$0xff] }
 0x133   : > { %1402 = vmatprep.subr.mxu1 %v3351_v19  ;;  %2213 = vmatprep.subr.mxu0 %v3049_v34  ;;  %v1578_v32 = vsub.f32 %v3069_v36, %v3090_v8  ;;  %v3137_v19 = vsub.f32 %v686_v6, %v3105_v41  ;;  %v3140_v25 = vand.u32 4294901760, %v680_v31  ;;  %v1592_v55 = vsub.f32 %v3097_v28, %v3120_v50 }
 0x134   : > { %1353 = vmatprep.mubr.f32.mxu0 %v3345_v43  ;;  %1404 = vmatpush1.msra.mxu1 %v3354_v33  ;;  %v3149_v33 = vand.u32 4294901760, %v677_v42 }
 0x135   : > { %2214 = vmatpush3.msra.mxu0 %v3049_v34  ;;  %1406 = vmatprep.subr.mxu1 %v3356_v15  ;;  %v3159_v21 = vand.u32 4294901760, %v3137_v19  ;;  %v3163_v0 = vsub.f32 %v680_v31, %v3140_v25  ;;  %v1593_v35 = vand.u32 4294901760, %v1592_v55 }
 0x136   : > { %1355 = vmatmul.mubr.f32.gmra.mxu0 %v2861_v23  ;;  %2215 = vmatprep.subr.mxu0 %v3063_v22  ;;  %v3173_v63 = vsub.f32 %v677_v42, %v3149_v33 }
 0x137   : > { %1408 = vmatpush1.msra.mxu1 %v2863_v24  ;;  %2216 = vmatpush3.msra.mxu0 %v3063_v22  ;;  %v1572_v24 = vand.u32 4294901760, %v1571_v52  ;;  %v1613_v30 = vsub.f32 %v3137_v19, %v3159_v21  ;;  %v3180_v57 = vand.u32 4294901760, %v3163_v0 }
 0x138   : > { %1410 = vmatprep.subr.mxu1 %v2895_v13  ;;  %2217 = vmatprep.subr.mxu0 %v3073_v54  ;;  %v1585_v13 = vsub.f32 %v3085_v48, %v3108_v62  ;;  %v3187_v47 = vand.u32 4294901760, %v3173_v63 }
 0x139   : > { %1412 = vmatpush1.msra.mxu1 %v2909_v5  ;;  %1445 = vmatprep.mubr.f32.mxu1 %v3345_v43  ;;  %v1579_v5 = vand.u32 4294901760, %v1578_v32  ;;  %v1614_v3 = vand.u32 4294901760, %v1613_v30  ;;  %v1627_v27 = vsub.f32 %v3163_v0, %v3180_v57 }
 0x13a   : > { %2218 = vmatpush3.msra.mxu0 %v3073_v54  ;;  %1447 = vmatmul.mubr.f32.vlgmr.msra.gmra.mxu1 %v2844_v40  ;;  %v1586_v15 = vand.u32 4294901760, %v1585_v13  ;;  %v1634_v61 = vsub.f32 %v3173_v63, %v3187_v47 }
 0x13b   : > { %2219 = vmatprep.subr.mxu0 %v3082_v38  ;;  %2234 = vmatprep.subr.mxu1 %v1572_v24  ;;  %v1628_v56 = vand.u32 4294901760, %v1627_v27 }
 0x13c   : > { %2220 = vmatpush3.msra.mxu0 %v3082_v38  ;;  %2235 = vmatpush3.msra.mxu1 %v1572_v24 }
 0x13d   : > { %2221 = vmatprep.subr.mxu0 %v3094_v44  ;;  %2236 = vmatprep.subr.mxu1 %v1579_v5 }
 0x13e   : > { %1452 = vmatprep.mubr.f32.mxu1 %v3345_v43  ;;  %2222 = vmatpush3.msra.mxu0 %v3094_v44  ;;  %v1606_v43 = vsub.f32 %v3123_v37, %v3146_v59 }
 0x13f   : > { %2237 = vmatpush3.msra.mxu1 %v1579_v5  ;;  %2223 = vmatprep.subr.mxu0 %v3105_v41 }
 0x140   : > { %1454 = vmatmul.mubr.f32.gmra.mxu1 %v2861_v23  ;;  %2238 = vmatprep.subr.mxu1 %v1586_v15  ;;  %v1607_v51 = vand.u32 4294901760, %v1606_v43 }
 0x141   : > { %2224 = vmatpush3.msra.mxu0 %v3105_v41  ;;  %2239 = vmatpush3.msra.mxu1 %v1586_v15 }
 0x142   : > { %2225 = vmatprep.subr.mxu0 %v3127_v10  ;;  %2240 = vmatprep.subr.mxu1 %v1593_v35 }
 0x143   : > { %2226 = vmatpush3.msra.mxu0 %v3127_v10  ;;  %2241 = vmatpush3.msra.mxu1 %v1593_v35 }
 0x144   : > { %2227 = vmatprep.subr.mxu0 %v3140_v25  ;;  %2242 = vmatprep.subr.mxu1 %v1600_v17 }
 0x145   : > { %2228 = vmatpush3.msra.mxu0 %v3140_v25  ;;  %2243 = vmatpush3.msra.mxu1 %v1600_v17 }
 0x146   : > { %2229 = vmatprep.subr.mxu0 %v3149_v33  ;;  %2244 = vmatprep.subr.mxu1 %v1607_v51 }
 0x147   : > { %2230 = vmatpush3.msra.mxu0 %v3149_v33  ;;  %2245 = vmatpush3.msra.mxu1 %v1607_v51 }
 0x148   : > { %2231 = vmatprep.mubr.f32.mxu0 %v2905_v9  ;;  %2246 = vmatprep.subr.mxu1 %v1614_v3  ;;  %v1635_v9 = vand.u32 4294901760, %v1634_v61 }
 0x149   : > { %2257 = vmatprep.subr.mxu0 %v3058_v12  ;;  %2232 = vmatmul.mubr.f32.vlgmr.msra.gmra.mxu0 %v2925_v7 }
 0x14a   : > { %2247 = vmatpush3.msra.mxu1 %v1614_v3  ;;  %2258 = vmatpush3.msra.mxu0 %v3058_v12 }
 0x14b   : > { %2248 = vmatprep.subr.mxu1 %v1621_v46  ;;  %2259 = vmatprep.subr.mxu0 %v3069_v36 }
 0x14c   : > { %2249 = vmatpush3.msra.mxu1 %v1621_v46  ;;  %2260 = vmatpush3.msra.mxu0 %v3069_v36 }
 0x14d   : > { %2250 = vmatprep.subr.mxu1 %v1628_v56  ;;  %2261 = vmatprep.subr.mxu0 %v3085_v48 }
 0x14e   : > { %2251 = vmatpush3.msra.mxu1 %v1628_v56  ;;  %2262 = vmatpush3.msra.mxu0 %v3085_v48 }
 0x14f   : > { %2252 = vmatprep.subr.mxu1 %v1635_v9  ;;  %2263 = vmatprep.subr.mxu0 %v3097_v28 }
 0x150   : > { %2253 = vmatpush3.msra.mxu1 %v1635_v9  ;;  %2254 = vmatprep.mubr.f32.mxu1 %v2844_v40 }
 0x151   : > { %2264 = vmatpush3.msra.mxu0 %v3097_v28  ;;  %2255 = vmatmul.mubr.f32.vlgmr.msra.gmra.mxu1 %v2861_v23 }
 0x152   : > { %2265 = vmatprep.subr.mxu0 %v3111_v1  ;;  %2280 = vmatprep.subr.mxu1 %v3041_v16 }
 0x153   : > { %2266 = vmatpush3.msra.mxu0 %v3111_v1  ;;  %2281 = vmatpush3.msra.mxu1 %v3041_v16 }
 0x154   : > { %2267 = vmatprep.subr.mxu0 %v3123_v37  ;;  %2282 = vmatprep.subr.mxu1 %v3049_v34 }
 0x155   : > { %2268 = vmatpush3.msra.mxu0 %v3123_v37  ;;  %2283 = vmatpush3.msra.mxu1 %v3049_v34 }
 0x156   : > { %2269 = vmatprep.subr.mxu0 %v3137_v19  ;;  %2284 = vmatprep.subr.mxu1 %v3063_v22 }
 0x157   : > { %2270 = vmatpush3.msra.mxu0 %v3137_v19  ;;  %2285 = vmatpush3.msra.mxu1 %v3063_v22 }
 0x158   : > { %2271 = vmatprep.subr.mxu0 %v3152_v2  ;;  %2286 = vmatprep.subr.mxu1 %v3073_v54 }
 0x159   : > { %2272 = vmatpush3.msra.mxu0 %v3152_v2  ;;  %2287 = vmatpush3.msra.mxu1 %v3073_v54 }
 0x15a   : > { %2273 = vmatprep.subr.mxu0 %v3163_v0  ;;  %2288 = vmatprep.subr.mxu1 %v3082_v38 }
 0x15b   : > { %2274 = vmatpush3.msra.mxu0 %v3163_v0  ;;  %2289 = vmatpush3.msra.mxu1 %v3082_v38 }
 0x15c   : > { %2275 = vmatprep.subr.mxu0 %v3173_v63  ;;  %2290 = vmatprep.subr.mxu1 %v3094_v44 }
 0x15d   : > { %2276 = vmatpush3.msra.mxu0 %v3173_v63  ;;  %2277 = vmatprep.mubr.f32.mxu0 %v2859_v18 }
 0x15e   : > { %2291 = vmatpush3.msra.mxu1 %v3094_v44  ;;  %2278 = vmatmul.mubr.f32.vlgmr.msra.gmra.mxu0 %v2880_v39 }
 0x15f   : > { %2292 = vmatprep.subr.mxu1 %v3105_v41  ;;  %2303 = vmatprep.subr.mxu0 %v3078_v20 }
 0x160   : > { %2293 = vmatpush3.msra.mxu1 %v3105_v41  ;;  %2304 = vmatpush3.msra.mxu0 %v3078_v20 }
 0x161   : > { %2294 = vmatprep.subr.mxu1 %v3127_v10  ;;  %2305 = vmatprep.subr.mxu0 %v3090_v8 }
 0x162   : > { %2295 = vmatpush3.msra.mxu1 %v3127_v10  ;;  %2306 = vmatpush3.msra.mxu0 %v3090_v8 }
 0x163   : > { %2296 = vmatprep.subr.mxu1 %v3140_v25  ;;  %2307 = vmatprep.subr.mxu0 %v3108_v62 }
 0x164   : > { %2297 = vmatpush3.msra.mxu1 %v3140_v25  ;;  %2308 = vmatpush3.msra.mxu0 %v3108_v62 }
 0x165   : > { %2298 = vmatprep.subr.mxu1 %v3149_v33  ;;  %2309 = vmatprep.subr.mxu0 %v3120_v50 }
 0x166   : > { %2299 = vmatpush3.msra.mxu1 %v3149_v33  ;;  %2300 = vmatprep.mubr.f32.mxu1 %v3361_v53 }
 0x167   : > { %2310 = vmatpush3.msra.mxu0 %v3120_v50  ;;  %2301 = vmatmul.mubr.f32.vlgmr.msra.gmra.mxu1 %v2893_v29 }
 0x168   : > { %2311 = vmatprep.subr.mxu0 %v3134_v45  ;;  %2326 = vmatprep.subr.mxu1 %v3041_v16 }
 0x169   : > { %2312 = vmatpush3.msra.mxu0 %v3134_v45  ;;  %2327 = vmatpush3.msra.mxu1 %v3041_v16 }
 0x16a   : > { %2313 = vmatprep.subr.mxu0 %v3146_v59  ;;  %2328 = vmatprep.subr.mxu1 %v3049_v34 }
 0x16b   : > { %2314 = vmatpush3.msra.mxu0 %v3146_v59  ;;  %2329 = vmatpush3.msra.mxu1 %v3049_v34 }
 0x16c   : > { %2315 = vmatprep.subr.mxu0 %v3159_v21  ;;  %2330 = vmatprep.subr.mxu1 %v3063_v22 }
 0x16d   : > { %2316 = vmatpush3.msra.mxu0 %v3159_v21  ;;  %2331 = vmatpush3.msra.mxu1 %v3063_v22 }
 0x16e   : > { %2317 = vmatprep.subr.mxu0 %v3170_v49  ;;  %2332 = vmatprep.subr.mxu1 %v3073_v54 }
 0x16f   : > { %2318 = vmatpush3.msra.mxu0 %v3170_v49  ;;  %2333 = vmatpush3.msra.mxu1 %v3073_v54 }
 0x170   : > { %2319 = vmatprep.subr.mxu0 %v3180_v57  ;;  %2334 = vmatprep.subr.mxu1 %v3082_v38 }
 0x171   : > { %2320 = vmatpush3.msra.mxu0 %v3180_v57  ;;  %2335 = vmatpush3.msra.mxu1 %v3082_v38 }
 0x172   : > { %2321 = vmatprep.subr.mxu0 %v3187_v47  ;;  %2336 = vmatprep.subr.mxu1 %v3094_v44 }
 0x173   : > { %2322 = vmatpush3.msra.mxu0 %v3187_v47  ;;  %2323 = vmatprep.mubr.f32.mxu0 %v2844_v40 }
 0x174   : > { %2337 = vmatpush3.msra.mxu1 %v3094_v44  ;;  %2324 = vmatmul.mubr.f32.vlgmr.msra.gmra.mxu0 %v2861_v23 }
 0x175   : > { %2338 = vmatprep.subr.mxu1 %v3105_v41  ;;  %2346 = vmatprep.mubr.f32.mxu1 %v2844_v40 }
 0x176   : > { %2339 = vmatpush3.msra.mxu1 %v3105_v41 }
 0x177   : > { %2340 = vmatprep.subr.mxu1 %v3127_v10 }
 0x178   : > { %2341 = vmatpush3.msra.mxu1 %v3127_v10 }
 0x179   : > { %2342 = vmatprep.subr.mxu1 %v3140_v25 }
 0x17a   : > { %2343 = vmatpush3.msra.mxu1 %v3140_v25 }
 0x17b   : > { %2344 = vmatprep.subr.mxu1 %v3149_v33 }
 0x17c   : > { %2345 = vmatpush3.msra.mxu1 %v3149_v33 }
 0x17d   : > { %2347 = vmatmul.mubr.f32.vlgmr.msra.gmra.mxu1 %v2861_v23 }
 0x1c3   : > { %v803_v39 = vpop.f32.mrf.mxu0 }
 0x1c5   : > { %v805_v18 = vpop.f32.mrf.mxu0 }
 0x1c7   : > { %v814_v29 = vpop.f32.mrf.mxu0 }
 0x1c9   : > { %v816_v7 = vpop.f32.mrf.mxu0 }
 0x1cb   : > { %v986_v40 = vpop.f32.mrf.mxu1 }
 0x1cc   : > { %v987_v26 = vadd.f32 %v986_v40, %v803_v39 }
 0x1cd   : > { %v988_v53 = vpop.f32.mrf.mxu1 }
 0x1ce   : > { %v989_v48 = vadd.f32 %v988_v53, %v805_v18 }
 0x1d8   : > { %v1106_v16 = vpop.f32.mrf.mxu0 }
 0x1d9   : > { %v993_v34 = vpop.f32.mrf.mxu1  ;;  %v1107_v23 = vadd.f32 %v1106_v16, %v987_v26 }
 0x1da   : > { %v1108_v58 = vpop.f32.mrf.mxu0  ;;  %v994_v6 = vadd.f32 %v993_v34, %v814_v29 }
 0x1db   : > { %v995_v12 = vpop.f32.mrf.mxu1  ;;  %v1109_v44 = vadd.f32 %v1108_v58, %v989_v48 }
 0x1dc   : > { %v996_v41 = vadd.f32 %v995_v12, %v816_v7 }
 0x1de   : > { %v1114_v22 = vpop.f32.mrf.mxu0 }
 0x1df   : > { %v1115_v50 = vadd.f32 %v1114_v22, %v994_v6 }
 0x1e0   : > { %v1116_v36 = vpop.f32.mrf.mxu0 }
 0x1e1   : > { %v1117_v10 = vadd.f32 %v1116_v36, %v996_v41 }
 0x1e2   : > { %v1208_v4 = vpop.f32.mrf.mxu1 }
 0x1e3   : > { %v1209_v28 = vadd.f32 %v1208_v4, %v1107_v23 }
 0x1e4   : > { %v1210_v54 = vpop.f32.mrf.mxu1 }
 0x1e5   : > { %v1211_v62 = vadd.f32 %v1210_v54, %v1109_v44 }
 0x1e8   : > { %v1217_v38 = vpop.f32.mrf.mxu1 }
 0x1e9   : > { %v1218_v13 = vadd.f32 %v1217_v38, %v1115_v50 }
 0x1ea   : > { %v1219_v52 = vpop.f32.mrf.mxu1 }
 0x1eb   : > { %v1220_v19 = vadd.f32 %v1219_v52, %v1117_v10 }
 0x1f0   : > { %v1349_v20 = vpop.f32.mrf.mxu0 }
 0x1f1   : > { %v1350_v14 = vadd.f32 %v1349_v20, %v1209_v28 }
 0x1f2   : > { %v1351_v8 = vpop.f32.mrf.mxu0 }
 0x1f3   : > { %v1352_v31 = vadd.f32 %v1351_v8, %v1211_v62 }
 0x1f6   : > { %v1356_v1 = vpop.f32.mrf.mxu0 }
 0x1f7   : > { %v1357_v5 = vadd.f32 %v1356_v1, %v1218_v13 }
 0x1f8   : > { %v1358_v42 = vpop.f32.mrf.mxu0 }
 0x1f9   : > { %v1359_v55 = vadd.f32 %v1358_v42, %v1220_v19 }
 0x1fa   : > { %v1448_v32 = vpop.f32.mrf.mxu1 }
 0x1fb   : > { %v1449_v37 = vadd.f32 %v1448_v32, %v1350_v14 }
 0x1fc   : > { %v1450_v24 = vpop.f32.mrf.mxu1 }
 0x1fd   : > { %2066 = vst [vmem:[%s3291_s12] sm:$0xff] %v1449_v37  ;;  %v1451_v45 = vadd.f32 %v1450_v24, %v1352_v31 }
 0x1ff   : > { %2067 = vst [vmem:[%s3291_s12 + $0x8] sm:$0xff] %v1451_v45 }
 0x200   : > { %v1455_v25 = vpop.f32.mrf.mxu1 }
 0x201   : > { %v1456_v59 = vadd.f32 %v1455_v25, %v1357_v5 }
 0x202   : > { %v1457_v33 = vpop.f32.mrf.mxu1 }
 0x203   : > { %2070 = vst [vmem:[%s3291_s12 + $0x18] sm:$0xff] %v1456_v59  ;;  %v1458_v2 = vadd.f32 %v1457_v33, %v1359_v55 }
 0x205   : > { %2071 = vst [vmem:[%s3291_s12 + $0x20] sm:$0xff] %v1458_v2 }
 0x209   : > { %v2233_v15 = vpop.f32.mrf.mxu0 }
 0x20b   : > { %v1541_v11 = vpop.f32.mrf.mxu0 }
 0x211   : > { %v2256_v21 = vpop.f32.mrf.mxu1 }
 0x212   : > { %v1679_v63 = vadd.f32 %v2256_v21, %v2233_v15 }
 0x213   : > { %v1672_v35 = vpop.f32.mrf.mxu1 }
 0x214   : > { %v1673_v30 = vadd.f32 %v1672_v35, %v1541_v11 }
 0x21e   : > { %v2279_v0 = vpop.f32.mrf.mxu0 }
 0x21f   : > { %v1778_v57 = vadd.f32 %v2279_v0, %v1679_v63 }
 0x220   : > { %v1770_v43 = vpop.f32.mrf.mxu0 }
 0x221   : > { %v1771_v60 = vadd.f32 %v1770_v43, %v1673_v30 }
 0x227   : > { %v2302_v49 = vpop.f32.mrf.mxu1 }
 0x228   : > { %v1869_v47 = vadd.f32 %v2302_v49, %v1778_v57 }
 0x229   : > { %v1860_v51 = vpop.f32.mrf.mxu1 }
 0x22a   : > { %v1861_v27 = vadd.f32 %v1860_v51, %v1771_v60 }
 0x234   : > { %v2325_v17 = vpop.f32.mrf.mxu0 }
 0x235   : > { %v1976_v46 = vadd.f32 %v2325_v17, %v1869_v47 }
 0x236   : > { %v1969_v3 = vpop.f32.mrf.mxu0 }
 0x237   : > { %v1970_v56 = vadd.f32 %v1969_v3, %v1861_v27 }
 0x23d   : > { %v2348_v61 = vpop.f32.mrf.mxu1 }
 0x23e   : > { %v2063_v9 = vadd.f32 %v2348_v61, %v1976_v46 }
 0x23f   : > { %v2056_v39 = vpop.f32.mrf.mxu1 }
 0x240   : > { %2072 = vst.msk [vmem:[%s3291_s12 + $0x28] sm:$0xff] %vm2068_vm1, %v2063_v9  ;;  %v2057_v18 = vadd.f32 %v2056_v39, %v1970_v56 }
 0x242   : > { %2069 = vst.msk [vmem:[%s3291_s12 + $0x10] sm:$0xff] %vm2068_vm1, %v2057_v18 }
 0x243 PF: > { %s12_s9 = sadd.s32 1, %s2381_s9  }
 0x244   : > { %p9_p4 = scmp.ge.s32.totalorder %s12_s9, 4  }
 0x246   :  { %11 = sbr.rel (!%p9_p4) target bundleno = 1 (0x1), region = 58 }

</bundles_post_ra>
